<compile_context>
chip_gen: v5e
topology: v5e:2x2
jax: 0.10.0
libtpu: 0.0.40
codegen_flags: <defaults>
</compile_context>

<pallas_src>
import functools

import jax
import jax.numpy as jnp
from jax import lax
from jax.experimental import pallas as pl
from jax.experimental.pallas import tpu as pltpu


def _pick_batch_tile(batch, qlen):
    """Smallest divisor of `batch` whose row tile (bt*qlen) reaches ~128 rows."""
    target = max(1, -(-128 // qlen))          # ceil(128 / qlen)
    for bt in range(target, batch + 1):
        if batch % bt == 0:
            return bt
    return batch


def _bf16_round(x):
    """Round an f32 array to bf16-representable values (kept in f32)."""
    return jnp.asarray(x, jnp.float32).astype(jnp.bfloat16).astype(jnp.float32)


# ----------------------------------------------------------------------------
# Kernel: one grid step == one batch tile of bt batch elements.
# ----------------------------------------------------------------------------
def _decoder_layer_kernel(w_ref, r_ref, mbias_ref, rwb_ref, rrb_ref,
                          qkv_w_ref, rproj_w_ref, o_w_ref,
                          ln1_g_ref, ln1_b_ref,
                          ff_w1_ref, ff_b1_ref, ff_w2_ref, ff_b2_ref,
                          ln2_g_ref, ln2_b_ref,
                          out_ref, attn_vec_ref,
                          *, bt, q_len, n_head, d_head, scale, eps):
    f32 = jnp.float32
    bf16 = jnp.bfloat16
    H, Dh = n_head, d_head
    HDh = H * Dh
    Q = q_len
    K = q_len        # TODO(synk): mems!=None (klen > qlen) not implemented.

    x_bf = w_ref[...]                                                  # (bt*Q, D) bf16

    # --- fused QKV + r projections: big-M bf16 MXU matmuls, f32 accumulation
    heads = jnp.dot(x_bf, qkv_w_ref[...], preferred_element_type=f32)  # (bt*Q, 3*HDh)
    heads_bf = heads.astype(bf16)
    r_k = jnp.dot(r_ref[...], rproj_w_ref[...], preferred_element_type=f32)  # (K, HDh)
    r_k_bf = r_k.astype(bf16)

    mask_bias = mbias_ref[...]                                         # (Q, K), -1e30 masked
    rwb = rwb_ref[...]                                                 # (H, Dh) f32
    rrb = rrb_ref[...]                                                 # (H, Dh) f32

    # --- rel-shift select masks, hoisted out of the per-(batch,head) loop ---
    # Row i of BD must be left-shifted by (K - 1 - i).  Decompose the per-row
    # shift greedily into log2(K) conditional power-of-two circular shifts
    # (slice+concat+select).  Values wrapping into j > i positions are garbage
    # but those positions get the -1e30 mask bias before softmax.
    nbits = max(1, (K - 1).bit_length())
    row = lax.broadcasted_iota(jnp.int32, (Q, 1), 0)
    remaining = (K - 1) - row
    shift_stages = []
    for bit in reversed(range(nbits)):
        step = 1 << bit
        take = remaining >= step
        shift_stages.append((step, take))
        remaining = jnp.where(take, remaining - step, remaining)

    def rel_shift(bd):
        cur = bd
        for step, take in shift_stages:
            rolled = jnp.concatenate([cur[:, step:], cur[:, :step]], axis=1)
            cur = jnp.where(take, rolled, cur)
        return cur

    dims = (((1,), (1,)), ((), ()))                                    # 'qd,kd->qk'

    for b in range(bt):
        r0 = b * Q
        for h in range(H):
            c0 = h * Dh
            q_h = heads[r0:r0 + Q, c0:c0 + Dh]                         # (Q, Dh) f32
            k_h = heads_bf[r0:r0 + Q, HDh + c0:HDh + c0 + Dh]          # (K, Dh) bf16
            v_h = heads_bf[r0:r0 + Q, 2 * HDh + c0:2 * HDh + c0 + Dh]  # (K, Dh) bf16
            r_h = r_k_bf[:, c0:c0 + Dh]                                # (K, Dh) bf16

            rw_q = (q_h + rwb[h:h + 1, :]).astype(bf16)
            rr_q = (q_h + rrb[h:h + 1, :]).astype(bf16)

            ac = lax.dot_general(rw_q, k_h, dims, preferred_element_type=f32)  # (Q, K)
            bd = lax.dot_general(rr_q, r_h, dims, preferred_element_type=f32)  # (Q, K)
            bd = rel_shift(bd)

            scores = (ac + bd) * scale + mask_bias
            m = jnp.max(scores, axis=1, keepdims=True)
            p = jnp.exp(scores - m)
            denom = jnp.sum(p, axis=1, keepdims=True)
            prob = p * pl.reciprocal(denom, approx=True)

            ctx = jnp.dot(prob.astype(bf16), v_h, preferred_element_type=f32)  # (Q, Dh)
            # per-head result lands at its lane offset -> no lane concat later
            attn_vec_ref[r0:r0 + Q, c0:c0 + Dh] = ctx

    # --- output projection: one (bt*Q, HDh) x (HDh, D) MXU matmul ---
    attn_out = jnp.dot(attn_vec_ref[...].astype(bf16), o_w_ref[...],
                       preferred_element_type=f32)                     # (bt*Q, D)

    # --- residual + LayerNorm (post-lnorm attention) ---
    x = x_bf.astype(f32) + attn_out
    mu = jnp.mean(x, axis=1, keepdims=True)
    var = jnp.mean(jnp.square(x - mu), axis=1, keepdims=True)
    xn = (x - mu) * lax.rsqrt(var + eps) * ln1_g_ref[...] + ln1_b_ref[...]

    # --- position-wise FF (post-lnorm) ---
    hid = jnp.dot(xn.astype(bf16), ff_w1_ref[...],
                  preferred_element_type=f32) + ff_b1_ref[...]
    hid = jnp.maximum(hid, 0.0)
    core = jnp.dot(hid.astype(bf16), ff_w2_ref[...],
                   preferred_element_type=f32) + ff_b2_ref[...]
    y = xn + core
    mu2 = jnp.mean(y, axis=1, keepdims=True)
    var2 = jnp.mean(jnp.square(y - mu2), axis=1, keepdims=True)
    y = (y - mu2) * lax.rsqrt(var2 + eps) * ln2_g_ref[...] + ln2_b_ref[...]

    out_ref[...] = y.astype(out_ref.dtype)


# ----------------------------------------------------------------------------
# Wrapper
# ----------------------------------------------------------------------------
def rel_partial_learnable_decoder_layer(dec_inp, r, r_w_bias, r_r_bias,
                                        dec_attn_mask, params, *,
                                        n_head, d_head):
    Q, B, D = dec_inp.shape
    R = r.shape[0]
    assert R == Q, "kernel assumes rlen == klen == qlen (mems=None)"
    H, Dh = n_head, d_head
    HDh = H * Dh
    bf16 = jnp.bfloat16
    f32 = jnp.float32

    bt = _pick_batch_tile(B, Q)
    nb = B // bt

    # (qlen, bsz, d) -> lane-dense (B*Q, D) rows, fused with the bf16 downcast.
    w2d = jnp.transpose(dec_inp, (1, 0, 2)).reshape(B * Q, D).astype(bf16)
    # Finite additive mask bias, computed once on the host.
    mask_bias = jnp.where(dec_attn_mask, f32(-1e30), f32(0.0))        # (Q, K)

    shared = [
        r.astype(bf16),
        mask_bias,
        r_w_bias.astype(f32), r_r_bias.astype(f32),
        params["qkv_w"].astype(bf16), params["r_w"].astype(bf16),
        params["o_w"].astype(bf16),
        params["ln1_g"].astype(f32), params["ln1_b"].astype(f32),
        params["ff_w1"].astype(bf16), params["ff_b1"].astype(f32),
        params["ff_w2"].astype(bf16), params["ff_b2"].astype(f32),
        params["ln2_g"].astype(f32), params["ln2_b"].astype(f32),
    ]

    def shared_spec(a):
        nd = a.ndim
        return pl.BlockSpec(a.shape, lambda i, _nd=nd: (0,) * _nd)

    in_specs = [pl.BlockSpec((bt * Q, D), lambda i: (i, 0))]
    in_specs += [shared_spec(a) for a in shared]

    kernel = functools.partial(_decoder_layer_kernel, bt=bt, q_len=Q,
                               n_head=H, d_head=Dh,
                               scale=1.0 / (Dh ** 0.5), eps=1e-5)

    out2d = pl.pallas_call(
        kernel,
        out_shape=jax.ShapeDtypeStruct((B * Q, D), f32),
        grid=(nb,),
        in_specs=in_specs,
        out_specs=pl.BlockSpec((bt * Q, D), lambda i: (i, 0)),
        scratch_shapes=[pltpu.VMEM((bt * Q, HDh), f32)],
        compiler_params=pltpu.CompilerParams(
            dimension_semantics=("parallel",),
            vmem_limit_bytes=32 * 1024 * 1024),
    )(w2d, *shared)

    return jnp.transpose(out2d.reshape(B, Q, D), (1, 0, 2))           # (Q, B, D)


# ----------------------------------------------------------------------------
# Pure-JAX reference (mirrors the PyTorch forward exactly, f32 HIGHEST)
# ----------------------------------------------------------------------------
def _layer_norm(x, g, b, eps=1e-5):
    mu = jnp.mean(x, axis=-1, keepdims=True)
    var = jnp.mean((x - mu) ** 2, axis=-1, keepdims=True)
    return (x - mu) / jnp.sqrt(var + eps) * g + b


def reference(dec_inp, r, r_w_bias, r_r_bias, mask, params, *, n_head, d_head):
    hp = lax.Precision.HIGHEST
    Q, B, D = dec_inp.shape
    R = r.shape[0]
    w_heads = jnp.einsum("qbd,de->qbe", dec_inp, params["qkv_w"], precision=hp)
    r_head_k = jnp.einsum("rd,de->re", r, params["r_w"], precision=hp)
    wq, wk, wv = jnp.split(w_heads, 3, axis=-1)
    wq = wq.reshape(Q, B, n_head, d_head)
    wk = wk.reshape(Q, B, n_head, d_head)
    wv = wv.reshape(Q, B, n_head, d_head)
    r_head_k = r_head_k.reshape(R, n_head, d_head)

    ac = jnp.einsum("ibnd,jbnd->ijbn", wq + r_w_bias, wk, precision=hp)
    bd = jnp.einsum("ibnd,jnd->ijbn", wq + r_r_bias, r_head_k, precision=hp)
    # _rel_shift (pad / view trick)
    zp = jnp.zeros((bd.shape[0], 1) + bd.shape[2:], bd.dtype)
    xp = jnp.concatenate([zp, bd], axis=1)
    xp = xp.reshape((bd.shape[1] + 1, bd.shape[0]) + bd.shape[2:])
    bd = xp[1:].reshape(bd.shape)

    score = (ac + bd) * (1.0 / d_head ** 0.5)
    score = jnp.where(mask[:, :, None, None], -jnp.inf, score)
    prob = jax.nn.softmax(score, axis=1)
    attn_vec = jnp.einsum("ijbn,jbnd->ibnd", prob, wv,
                          precision=hp).reshape(Q, B, n_head * d_head)
    attn_out = jnp.einsum("qbe,ed->qbd", attn_vec, params["o_w"], precision=hp)
    x = _layer_norm(dec_inp + attn_out,
                    params["ln1_g"].reshape(-1), params["ln1_b"].reshape(-1))
    hid = jnp.maximum(
        jnp.einsum("qbd,di->qbi", x, params["ff_w1"], precision=hp)
        + params["ff_b1"].reshape(-1), 0.0)
    core = jnp.einsum("qbi,id->qbd", hid, params["ff_w2"], precision=hp) \
        + params["ff_b2"].reshape(-1)
    return _layer_norm(x + core,
                       params["ln2_g"].reshape(-1), params["ln2_b"].reshape(-1))


# ----------------------------------------------------------------------------
if __name__ == "__main__":
    Q, B = 8, 2                 # qlen, batch
    H, Dh = 2, 16               # n_head, d_head
    D = H * Dh                  # d_model = 32
    d_inner = 64

    key = jax.random.PRNGKey(0)
    ks = jax.random.split(key, 16)

    # Inputs/weights are made bf16-representable so the f32 reference and the
    # bf16-matmul kernel see identical operand values.
    def nrm(k, shape, s=0.05):
        return _bf16_round(s * jax.random.normal(k, shape))

    params = dict(
        qkv_w=nrm(ks[0], (D, 3 * H * Dh)),     # qkv_net.weight^T (no bias)
        r_w=nrm(ks[1], (D, H * Dh)),           # r_net.weight^T  (no bias)
        o_w=nrm(ks[2], (H * Dh, D)),           # o_net.weight^T  (no bias)
        ln1_g=_bf16_round(1.0 + 0.05 * jax.random.normal(ks[3], (1, D))),
        ln1_b=nrm(ks[4], (1, D)),
        ff_w1=nrm(ks[5], (D, d_inner)),
        ff_b1=nrm(ks[6], (1, d_inner)),
        ff_w2=nrm(ks[7], (d_inner, D)),
        ff_b2=nrm(ks[8], (1, D)),
        ln2_g=_bf16_round(1.0 + 0.05 * jax.random.normal(ks[9], (1, D))),
        ln2_b=nrm(ks[10], (1, D)),
    )

    dec_inp = _bf16_round(jax.random.normal(ks[11], (Q, B, D), jnp.float32))
    r = _bf16_round(jax.random.normal(ks[12], (Q, D), jnp.float32))
    r_w_bias = _bf16_round(0.1 * jax.random.normal(ks[13], (H, Dh)))
    r_r_bias = _bf16_round(0.1 * jax.random.normal(ks[14], (H, Dh)))
    dec_attn_mask = jnp.triu(jnp.ones((Q, Q), dtype=bool), k=1)   # causal

    out = rel_partial_learnable_decoder_layer(
        dec_inp, r, r_w_bias, r_r_bias, dec_attn_mask, params,
        n_head=H, d_head=Dh)
    out = jax.block_until_ready(out)

    ref = reference(dec_inp, r, r_w_bias, r_r_bias, dec_attn_mask, params,
                    n_head=H, d_head=Dh)

    assert out.shape == (Q, B, D)
    assert bool(jnp.all(jnp.isfinite(out)))
    max_err = float(jnp.max(jnp.abs(out - ref)))
    assert max_err < 2e-2, f"mismatch vs reference: {max_err}"
    print("KERNEL_OK")
</pallas_src>

<mosaic_0001>
module attributes {stable_mosaic.version = 11 : i64} {
  func.func @_decoder_layer_kernel(%arg0: i32, %arg1: memref<16x32xbf16, #tpu.memory_space<vmem>>, %arg2: memref<8x32xbf16, #tpu.memory_space<vmem>>, %arg3: memref<8x8xf32, #tpu.memory_space<vmem>>, %arg4: memref<2x16xf32, #tpu.memory_space<vmem>>, %arg5: memref<2x16xf32, #tpu.memory_space<vmem>>, %arg6: memref<32x96xbf16, #tpu.memory_space<vmem>>, %arg7: memref<32x32xbf16, #tpu.memory_space<vmem>>, %arg8: memref<32x32xbf16, #tpu.memory_space<vmem>>, %arg9: memref<1x32xf32, #tpu.memory_space<vmem>>, %arg10: memref<1x32xf32, #tpu.memory_space<vmem>>, %arg11: memref<32x64xbf16, #tpu.memory_space<vmem>>, %arg12: memref<1x64xf32, #tpu.memory_space<vmem>>, %arg13: memref<64x32xbf16, #tpu.memory_space<vmem>>, %arg14: memref<1x32xf32, #tpu.memory_space<vmem>>, %arg15: memref<1x32xf32, #tpu.memory_space<vmem>>, %arg16: memref<1x32xf32, #tpu.memory_space<vmem>>, %arg17: memref<16x32xf32, #tpu.memory_space<vmem>>, %arg18: memref<16x32xf32, #tpu.memory_space<vmem>>) attributes {dimension_semantics = [#tpu.dimension_semantics<parallel>], iteration_bounds = array<i64: 1>, scalar_prefetch = 0 : i64, scratch_operands = 1 : i64, tpu.core_type = #tpu.core_type<tc>, window_params = [{transform_indices = @transform_0, window_bounds = array<i64: 16, 32>}, {pipeline_mode = #tpu.pipeline_mode<synchronous>, transform_indices = @transform_1, window_bounds = array<i64: 8, 32>}, {pipeline_mode = #tpu.pipeline_mode<synchronous>, transform_indices = @transform_2, window_bounds = array<i64: 8, 8>}, {pipeline_mode = #tpu.pipeline_mode<synchronous>, transform_indices = @transform_3, window_bounds = array<i64: 2, 16>}, {pipeline_mode = #tpu.pipeline_mode<synchronous>, transform_indices = @transform_4, window_bounds = array<i64: 2, 16>}, {pipeline_mode = #tpu.pipeline_mode<synchronous>, transform_indices = @transform_5, window_bounds = array<i64: 32, 96>}, {pipeline_mode = #tpu.pipeline_mode<synchronous>, transform_indices = @transform_6, window_bounds = array<i64: 32, 32>}, {pipeline_mode = #tpu.pipeline_mode<synchronous>, transform_indices = @transform_7, window_bounds = array<i64: 32, 32>}, {pipeline_mode = #tpu.pipeline_mode<synchronous>, transform_indices = @transform_8, window_bounds = array<i64: 1, 32>}, {pipeline_mode = #tpu.pipeline_mode<synchronous>, transform_indices = @transform_9, window_bounds = array<i64: 1, 32>}, {pipeline_mode = #tpu.pipeline_mode<synchronous>, transform_indices = @transform_10, window_bounds = array<i64: 32, 64>}, {pipeline_mode = #tpu.pipeline_mode<synchronous>, transform_indices = @transform_11, window_bounds = array<i64: 1, 64>}, {pipeline_mode = #tpu.pipeline_mode<synchronous>, transform_indices = @transform_12, window_bounds = array<i64: 64, 32>}, {pipeline_mode = #tpu.pipeline_mode<synchronous>, transform_indices = @transform_13, window_bounds = array<i64: 1, 32>}, {pipeline_mode = #tpu.pipeline_mode<synchronous>, transform_indices = @transform_14, window_bounds = array<i64: 1, 32>}, {pipeline_mode = #tpu.pipeline_mode<synchronous>, transform_indices = @transform_15, window_bounds = array<i64: 1, 32>}, {transform_indices = @transform_16, window_bounds = array<i64: 16, 32>}]} {
    %c0 = arith.constant 0 : index
    %c0_0 = arith.constant 0 : index
    %0 = vector.load %arg1[%c0, %c0_0] : memref<16x32xbf16, #tpu.memory_space<vmem>>, vector<16x32xbf16>
    %c0_1 = arith.constant 0 : index
    %c0_2 = arith.constant 0 : index
    %1 = vector.load %arg6[%c0_1, %c0_2] : memref<32x96xbf16, #tpu.memory_space<vmem>>, vector<32x96xbf16>
    %cst = arith.constant dense<0.000000e+00> : vector<16x96xf32>
    %2 = tpu.matmul %0, %1, %cst {dimension_numbers = #tpu.dot_dimension_numbers<[1], [0], [0], [1], [0, 0, 1, 1], [], []>} : vector<16x32xbf16>, vector<32x96xbf16>, vector<16x96xf32> -> vector<16x96xf32>
    %3 = arith.truncf %2 : vector<16x96xf32> to vector<16x96xbf16>
    %c0_3 = arith.constant 0 : index
    %c0_4 = arith.constant 0 : index
    %4 = vector.load %arg2[%c0_3, %c0_4] : memref<8x32xbf16, #tpu.memory_space<vmem>>, vector<8x32xbf16>
    %c0_5 = arith.constant 0 : index
    %c0_6 = arith.constant 0 : index
    %5 = vector.load %arg7[%c0_5, %c0_6] : memref<32x32xbf16, #tpu.memory_space<vmem>>, vector<32x32xbf16>
    %cst_7 = arith.constant dense<0.000000e+00> : vector<8x32xf32>
    %6 = tpu.matmul %4, %5, %cst_7 {dimension_numbers = #tpu.dot_dimension_numbers<[1], [0], [0], [1], [0, 0, 1, 1], [], []>} : vector<8x32xbf16>, vector<32x32xbf16>, vector<8x32xf32> -> vector<8x32xf32>
    %7 = arith.truncf %6 : vector<8x32xf32> to vector<8x32xbf16>
    %c0_8 = arith.constant 0 : index
    %c0_9 = arith.constant 0 : index
    %8 = vector.load %arg3[%c0_8, %c0_9] : memref<8x8xf32, #tpu.memory_space<vmem>>, vector<8x8xf32>
    %c0_10 = arith.constant 0 : index
    %c0_11 = arith.constant 0 : index
    %9 = vector.load %arg4[%c0_10, %c0_11] : memref<2x16xf32, #tpu.memory_space<vmem>>, vector<2x16xf32>
    %c0_12 = arith.constant 0 : index
    %c0_13 = arith.constant 0 : index
    %10 = vector.load %arg5[%c0_12, %c0_13] : memref<2x16xf32, #tpu.memory_space<vmem>>, vector<2x16xf32>
    %11 = tpu.iota {dimensions = array<i32: 0>} : vector<8x1xi32>
    %c7_i32 = arith.constant 7 : i32
    %12 = vector.broadcast %c7_i32 : i32 to vector<8x1xi32>
    %13 = arith.subi %12, %11 : vector<8x1xi32>
    %c4_i32 = arith.constant 4 : i32
    %14 = vector.broadcast %c4_i32 : i32 to vector<8x1xi32>
    %15 = arith.cmpi sge, %13, %14 : vector<8x1xi32>
    %c4_i32_14 = arith.constant 4 : i32
    %16 = vector.broadcast %c4_i32_14 : i32 to vector<8x1xi32>
    %17 = arith.subi %13, %16 : vector<8x1xi32>
    %18 = arith.select %15, %17, %13 : vector<8x1xi1>, vector<8x1xi32>
    %c2_i32 = arith.constant 2 : i32
    %19 = vector.broadcast %c2_i32 : i32 to vector<8x1xi32>
    %20 = arith.cmpi sge, %18, %19 : vector<8x1xi32>
    %c2_i32_15 = arith.constant 2 : i32
    %21 = vector.broadcast %c2_i32_15 : i32 to vector<8x1xi32>
    %22 = arith.subi %18, %21 : vector<8x1xi32>
    %23 = arith.select %20, %22, %18 : vector<8x1xi1>, vector<8x1xi32>
    %c1_i32 = arith.constant 1 : i32
    %24 = vector.broadcast %c1_i32 : i32 to vector<8x1xi32>
    %25 = arith.cmpi sge, %23, %24 : vector<8x1xi32>
    %26 = vector.extract_strided_slice %2 {offsets = [0, 0], sizes = [8, 16], strides = [1, 1]} : vector<16x96xf32> to vector<8x16xf32>
    %27 = vector.extract_strided_slice %3 {offsets = [0, 32], sizes = [8, 16], strides = [1, 1]} : vector<16x96xbf16> to vector<8x16xbf16>
    %28 = vector.extract_strided_slice %3 {offsets = [0, 64], sizes = [8, 16], strides = [1, 1]} : vector<16x96xbf16> to vector<8x16xbf16>
    %29 = vector.extract_strided_slice %7 {offsets = [0, 0], sizes = [8, 16], strides = [1, 1]} : vector<8x32xbf16> to vector<8x16xbf16>
    %30 = vector.extract_strided_slice %9 {offsets = [0, 0], sizes = [1, 16], strides = [1, 1]} : vector<2x16xf32> to vector<1x16xf32>
    %31 = vector.broadcast %30 : vector<1x16xf32> to vector<8x16xf32>
    %32 = arith.addf %26, %31 : vector<8x16xf32>
    %33 = arith.truncf %32 : vector<8x16xf32> to vector<8x16xbf16>
    %34 = vector.extract_strided_slice %10 {offsets = [0, 0], sizes = [1, 16], strides = [1, 1]} : vector<2x16xf32> to vector<1x16xf32>
    %35 = vector.broadcast %34 : vector<1x16xf32> to vector<8x16xf32>
    %36 = arith.addf %26, %35 : vector<8x16xf32>
    %37 = arith.truncf %36 : vector<8x16xf32> to vector<8x16xbf16>
    %cst_16 = arith.constant dense<0.000000e+00> : vector<8x8xf32>
    %38 = tpu.matmul %33, %27, %cst_16 {dimension_numbers = #tpu.dot_dimension_numbers<[1], [1], [0], [0], [0, 0, 1, 0], [], []>} : vector<8x16xbf16>, vector<8x16xbf16>, vector<8x8xf32> -> vector<8x8xf32>
    %cst_17 = arith.constant dense<0.000000e+00> : vector<8x8xf32>
    %39 = tpu.matmul %37, %29, %cst_17 {dimension_numbers = #tpu.dot_dimension_numbers<[1], [1], [0], [0], [0, 0, 1, 0], [], []>} : vector<8x16xbf16>, vector<8x16xbf16>, vector<8x8xf32> -> vector<8x8xf32>
    %40 = vector.extract_strided_slice %39 {offsets = [0, 4], sizes = [8, 4], strides = [1, 1]} : vector<8x8xf32> to vector<8x4xf32>
    %41 = vector.extract_strided_slice %39 {offsets = [0, 0], sizes = [8, 4], strides = [1, 1]} : vector<8x8xf32> to vector<8x4xf32>
    %42 = tpu.concatenate %40, %41 in 1 : vector<8x4xf32>, vector<8x4xf32> -> vector<8x8xf32>
    %43 = vector.shape_cast %15 : vector<8x1xi1> to vector<8x1xi1>
    %44 = vector.broadcast %43 : vector<8x1xi1> to vector<8x8xi1>
    %45 = arith.select %44, %42, %39 : vector<8x8xi1>, vector<8x8xf32>
    %46 = vector.extract_strided_slice %45 {offsets = [0, 2], sizes = [8, 6], strides = [1, 1]} : vector<8x8xf32> to vector<8x6xf32>
    %47 = vector.extract_strided_slice %45 {offsets = [0, 0], sizes = [8, 2], strides = [1, 1]} : vector<8x8xf32> to vector<8x2xf32>
    %48 = tpu.concatenate %46, %47 in 1 : vector<8x6xf32>, vector<8x2xf32> -> vector<8x8xf32>
    %49 = vector.shape_cast %20 : vector<8x1xi1> to vector<8x1xi1>
    %50 = vector.broadcast %49 : vector<8x1xi1> to vector<8x8xi1>
    %51 = arith.select %50, %48, %45 : vector<8x8xi1>, vector<8x8xf32>
    %52 = vector.extract_strided_slice %51 {offsets = [0, 1], sizes = [8, 7], strides = [1, 1]} : vector<8x8xf32> to vector<8x7xf32>
    %53 = vector.extract_strided_slice %51 {offsets = [0, 0], sizes = [8, 1], strides = [1, 1]} : vector<8x8xf32> to vector<8x1xf32>
    %54 = tpu.concatenate %52, %53 in 1 : vector<8x7xf32>, vector<8x1xf32> -> vector<8x8xf32>
    %55 = vector.shape_cast %25 : vector<8x1xi1> to vector<8x1xi1>
    %56 = vector.broadcast %55 : vector<8x1xi1> to vector<8x8xi1>
    %57 = arith.select %56, %54, %51 : vector<8x8xi1>, vector<8x8xf32>
    %58 = arith.addf %38, %57 : vector<8x8xf32>
    %cst_18 = arith.constant 2.500000e-01 : f32
    %59 = vector.broadcast %cst_18 : f32 to vector<8x8xf32>
    %60 = arith.mulf %58, %59 : vector<8x8xf32>
    %61 = arith.addf %60, %8 : vector<8x8xf32>
    %cst_19 = arith.constant dense<0xFF800000> : vector<8xf32>
    %62 = vector.multi_reduction <maximumf>, %61, %cst_19 [1] : vector<8x8xf32> to vector<8xf32>
    %63 = vector.shape_cast %62 : vector<8xf32> to vector<8x1xf32>
    %64 = vector.broadcast %63 : vector<8x1xf32> to vector<8x8xf32>
    %65 = arith.subf %61, %64 : vector<8x8xf32>
    %66 = math.exp %65 : vector<8x8xf32>
    %cst_20 = arith.constant dense<0.000000e+00> : vector<8xf32>
    %67 = vector.multi_reduction <add>, %66, %cst_20 [1] : vector<8x8xf32> to vector<8xf32>
    %68 = vector.shape_cast %67 : vector<8xf32> to vector<8x1xf32>
    %69 = tpu.reciprocal %68 {approx = true} : vector<8x1xf32> -> vector<8x1xf32>
    %70 = vector.broadcast %69 : vector<8x1xf32> to vector<8x8xf32>
    %71 = arith.mulf %66, %70 : vector<8x8xf32>
    %72 = arith.truncf %71 : vector<8x8xf32> to vector<8x8xbf16>
    %cst_21 = arith.constant dense<0.000000e+00> : vector<8x16xf32>
    %73 = tpu.matmul %72, %28, %cst_21 {dimension_numbers = #tpu.dot_dimension_numbers<[1], [0], [0], [1], [0, 0, 1, 1], [], []>} : vector<8x8xbf16>, vector<8x16xbf16>, vector<8x16xf32> -> vector<8x16xf32>
    %c0_22 = arith.constant 0 : index
    %c0_23 = arith.constant 0 : index
    %74 = vector.load %arg18[%c0_22, %c0_23] : memref<16x32xf32, #tpu.memory_space<vmem>>, vector<8x16xf32>
    tpu.vector_store %arg18[%c0_22, %c0_23], %73 {strides = array<i32>} : memref<16x32xf32, #tpu.memory_space<vmem>>, vector<8x16xf32>,
    %75 = vector.extract_strided_slice %2 {offsets = [0, 16], sizes = [8, 16], strides = [1, 1]} : vector<16x96xf32> to vector<8x16xf32>
    %76 = vector.extract_strided_slice %3 {offsets = [0, 48], sizes = [8, 16], strides = [1, 1]} : vector<16x96xbf16> to vector<8x16xbf16>
    %77 = vector.extract_strided_slice %3 {offsets = [0, 80], sizes = [8, 16], strides = [1, 1]} : vector<16x96xbf16> to vector<8x16xbf16>
    %78 = vector.extract_strided_slice %7 {offsets = [0, 16], sizes = [8, 16], strides = [1, 1]} : vector<8x32xbf16> to vector<8x16xbf16>
    %79 = vector.extract_strided_slice %9 {offsets = [1, 0], sizes = [1, 16], strides = [1, 1]} : vector<2x16xf32> to vector<1x16xf32>
    %80 = vector.broadcast %79 : vector<1x16xf32> to vector<8x16xf32>
    %81 = arith.addf %75, %80 : vector<8x16xf32>
    %82 = arith.truncf %81 : vector<8x16xf32> to vector<8x16xbf16>
    %83 = vector.extract_strided_slice %10 {offsets = [1, 0], sizes = [1, 16], strides = [1, 1]} : vector<2x16xf32> to vector<1x16xf32>
    %84 = vector.broadcast %83 : vector<1x16xf32> to vector<8x16xf32>
    %85 = arith.addf %75, %84 : vector<8x16xf32>
    %86 = arith.truncf %85 : vector<8x16xf32> to vector<8x16xbf16>
    %cst_24 = arith.constant dense<0.000000e+00> : vector<8x8xf32>
    %87 = tpu.matmul %82, %76, %cst_24 {dimension_numbers = #tpu.dot_dimension_numbers<[1], [1], [0], [0], [0, 0, 1, 0], [], []>} : vector<8x16xbf16>, vector<8x16xbf16>, vector<8x8xf32> -> vector<8x8xf32>
    %cst_25 = arith.constant dense<0.000000e+00> : vector<8x8xf32>
    %88 = tpu.matmul %86, %78, %cst_25 {dimension_numbers = #tpu.dot_dimension_numbers<[1], [1], [0], [0], [0, 0, 1, 0], [], []>} : vector<8x16xbf16>, vector<8x16xbf16>, vector<8x8xf32> -> vector<8x8xf32>
    %89 = vector.extract_strided_slice %88 {offsets = [0, 4], sizes = [8, 4], strides = [1, 1]} : vector<8x8xf32> to vector<8x4xf32>
    %90 = vector.extract_strided_slice %88 {offsets = [0, 0], sizes = [8, 4], strides = [1, 1]} : vector<8x8xf32> to vector<8x4xf32>
    %91 = tpu.concatenate %89, %90 in 1 : vector<8x4xf32>, vector<8x4xf32> -> vector<8x8xf32>
    %92 = vector.shape_cast %15 : vector<8x1xi1> to vector<8x1xi1>
    %93 = vector.broadcast %92 : vector<8x1xi1> to vector<8x8xi1>
    %94 = arith.select %93, %91, %88 : vector<8x8xi1>, vector<8x8xf32>
    %95 = vector.extract_strided_slice %94 {offsets = [0, 2], sizes = [8, 6], strides = [1, 1]} : vector<8x8xf32> to vector<8x6xf32>
    %96 = vector.extract_strided_slice %94 {offsets = [0, 0], sizes = [8, 2], strides = [1, 1]} : vector<8x8xf32> to vector<8x2xf32>
    %97 = tpu.concatenate %95, %96 in 1 : vector<8x6xf32>, vector<8x2xf32> -> vector<8x8xf32>
    %98 = vector.shape_cast %20 : vector<8x1xi1> to vector<8x1xi1>
    %99 = vector.broadcast %98 : vector<8x1xi1> to vector<8x8xi1>
    %100 = arith.select %99, %97, %94 : vector<8x8xi1>, vector<8x8xf32>
    %101 = vector.extract_strided_slice %100 {offsets = [0, 1], sizes = [8, 7], strides = [1, 1]} : vector<8x8xf32> to vector<8x7xf32>
    %102 = vector.extract_strided_slice %100 {offsets = [0, 0], sizes = [8, 1], strides = [1, 1]} : vector<8x8xf32> to vector<8x1xf32>
    %103 = tpu.concatenate %101, %102 in 1 : vector<8x7xf32>, vector<8x1xf32> -> vector<8x8xf32>
    %104 = vector.shape_cast %25 : vector<8x1xi1> to vector<8x1xi1>
    %105 = vector.broadcast %104 : vector<8x1xi1> to vector<8x8xi1>
    %106 = arith.select %105, %103, %100 : vector<8x8xi1>, vector<8x8xf32>
    %107 = arith.addf %87, %106 : vector<8x8xf32>
    %cst_26 = arith.constant 2.500000e-01 : f32
    %108 = vector.broadcast %cst_26 : f32 to vector<8x8xf32>
    %109 = arith.mulf %107, %108 : vector<8x8xf32>
    %110 = arith.addf %109, %8 : vector<8x8xf32>
    %cst_27 = arith.constant dense<0xFF800000> : vector<8xf32>
    %111 = vector.multi_reduction <maximumf>, %110, %cst_27 [1] : vector<8x8xf32> to vector<8xf32>
    %112 = vector.shape_cast %111 : vector<8xf32> to vector<8x1xf32>
    %113 = vector.broadcast %112 : vector<8x1xf32> to vector<8x8xf32>
    %114 = arith.subf %110, %113 : vector<8x8xf32>
    %115 = math.exp %114 : vector<8x8xf32>
    %cst_28 = arith.constant dense<0.000000e+00> : vector<8xf32>
    %116 = vector.multi_reduction <add>, %115, %cst_28 [1] : vector<8x8xf32> to vector<8xf32>
    %117 = vector.shape_cast %116 : vector<8xf32> to vector<8x1xf32>
    %118 = tpu.reciprocal %117 {approx = true} : vector<8x1xf32> -> vector<8x1xf32>
    %119 = vector.broadcast %118 : vector<8x1xf32> to vector<8x8xf32>
    %120 = arith.mulf %115, %119 : vector<8x8xf32>
    %121 = arith.truncf %120 : vector<8x8xf32> to vector<8x8xbf16>
    %cst_29 = arith.constant dense<0.000000e+00> : vector<8x16xf32>
    %122 = tpu.matmul %121, %77, %cst_29 {dimension_numbers = #tpu.dot_dimension_numbers<[1], [0], [0], [1], [0, 0, 1, 1], [], []>} : vector<8x8xbf16>, vector<8x16xbf16>, vector<8x16xf32> -> vector<8x16xf32>
    %c0_30 = arith.constant 0 : index
    %c16 = arith.constant 16 : index
    %123 = vector.load %arg18[%c0_30, %c16] : memref<16x32xf32, #tpu.memory_space<vmem>>, vector<8x16xf32>
    tpu.vector_store %arg18[%c0_30, %c16], %122 {strides = array<i32>} : memref<16x32xf32, #tpu.memory_space<vmem>>, vector<8x16xf32>,
    %124 = vector.extract_strided_slice %2 {offsets = [8, 0], sizes = [8, 16], strides = [1, 1]} : vector<16x96xf32> to vector<8x16xf32>
    %125 = vector.extract_strided_slice %3 {offsets = [8, 32], sizes = [8, 16], strides = [1, 1]} : vector<16x96xbf16> to vector<8x16xbf16>
    %126 = vector.extract_strided_slice %3 {offsets = [8, 64], sizes = [8, 16], strides = [1, 1]} : vector<16x96xbf16> to vector<8x16xbf16>
    %127 = vector.extract_strided_slice %7 {offsets = [0, 0], sizes = [8, 16], strides = [1, 1]} : vector<8x32xbf16> to vector<8x16xbf16>
    %128 = vector.extract_strided_slice %9 {offsets = [0, 0], sizes = [1, 16], strides = [1, 1]} : vector<2x16xf32> to vector<1x16xf32>
    %129 = vector.broadcast %128 : vector<1x16xf32> to vector<8x16xf32>
    %130 = arith.addf %124, %129 : vector<8x16xf32>
    %131 = arith.truncf %130 : vector<8x16xf32> to vector<8x16xbf16>
    %132 = vector.extract_strided_slice %10 {offsets = [0, 0], sizes = [1, 16], strides = [1, 1]} : vector<2x16xf32> to vector<1x16xf32>
    %133 = vector.broadcast %132 : vector<1x16xf32> to vector<8x16xf32>
    %134 = arith.addf %124, %133 : vector<8x16xf32>
    %135 = arith.truncf %134 : vector<8x16xf32> to vector<8x16xbf16>
    %cst_31 = arith.constant dense<0.000000e+00> : vector<8x8xf32>
    %136 = tpu.matmul %131, %125, %cst_31 {dimension_numbers = #tpu.dot_dimension_numbers<[1], [1], [0], [0], [0, 0, 1, 0], [], []>} : vector<8x16xbf16>, vector<8x16xbf16>, vector<8x8xf32> -> vector<8x8xf32>
    %cst_32 = arith.constant dense<0.000000e+00> : vector<8x8xf32>
    %137 = tpu.matmul %135, %127, %cst_32 {dimension_numbers = #tpu.dot_dimension_numbers<[1], [1], [0], [0], [0, 0, 1, 0], [], []>} : vector<8x16xbf16>, vector<8x16xbf16>, vector<8x8xf32> -> vector<8x8xf32>
    %138 = vector.extract_strided_slice %137 {offsets = [0, 4], sizes = [8, 4], strides = [1, 1]} : vector<8x8xf32> to vector<8x4xf32>
    %139 = vector.extract_strided_slice %137 {offsets = [0, 0], sizes = [8, 4], strides = [1, 1]} : vector<8x8xf32> to vector<8x4xf32>
    %140 = tpu.concatenate %138, %139 in 1 : vector<8x4xf32>, vector<8x4xf32> -> vector<8x8xf32>
    %141 = vector.shape_cast %15 : vector<8x1xi1> to vector<8x1xi1>
    %142 = vector.broadcast %141 : vector<8x1xi1> to vector<8x8xi1>
    %143 = arith.select %142, %140, %137 : vector<8x8xi1>, vector<8x8xf32>
    %144 = vector.extract_strided_slice %143 {offsets = [0, 2], sizes = [8, 6], strides = [1, 1]} : vector<8x8xf32> to vector<8x6xf32>
    %145 = vector.extract_strided_slice %143 {offsets = [0, 0], sizes = [8, 2], strides = [1, 1]} : vector<8x8xf32> to vector<8x2xf32>
    %146 = tpu.concatenate %144, %145 in 1 : vector<8x6xf32>, vector<8x2xf32> -> vector<8x8xf32>
    %147 = vector.shape_cast %20 : vector<8x1xi1> to vector<8x1xi1>
    %148 = vector.broadcast %147 : vector<8x1xi1> to vector<8x8xi1>
    %149 = arith.select %148, %146, %143 : vector<8x8xi1>, vector<8x8xf32>
    %150 = vector.extract_strided_slice %149 {offsets = [0, 1], sizes = [8, 7], strides = [1, 1]} : vector<8x8xf32> to vector<8x7xf32>
    %151 = vector.extract_strided_slice %149 {offsets = [0, 0], sizes = [8, 1], strides = [1, 1]} : vector<8x8xf32> to vector<8x1xf32>
    %152 = tpu.concatenate %150, %151 in 1 : vector<8x7xf32>, vector<8x1xf32> -> vector<8x8xf32>
    %153 = vector.shape_cast %25 : vector<8x1xi1> to vector<8x1xi1>
    %154 = vector.broadcast %153 : vector<8x1xi1> to vector<8x8xi1>
    %155 = arith.select %154, %152, %149 : vector<8x8xi1>, vector<8x8xf32>
    %156 = arith.addf %136, %155 : vector<8x8xf32>
    %cst_33 = arith.constant 2.500000e-01 : f32
    %157 = vector.broadcast %cst_33 : f32 to vector<8x8xf32>
    %158 = arith.mulf %156, %157 : vector<8x8xf32>
    %159 = arith.addf %158, %8 : vector<8x8xf32>
    %cst_34 = arith.constant dense<0xFF800000> : vector<8xf32>
    %160 = vector.multi_reduction <maximumf>, %159, %cst_34 [1] : vector<8x8xf32> to vector<8xf32>
    %161 = vector.shape_cast %160 : vector<8xf32> to vector<8x1xf32>
    %162 = vector.broadcast %161 : vector<8x1xf32> to vector<8x8xf32>
    %163 = arith.subf %159, %162 : vector<8x8xf32>
    %164 = math.exp %163 : vector<8x8xf32>
    %cst_35 = arith.constant dense<0.000000e+00> : vector<8xf32>
    %165 = vector.multi_reduction <add>, %164, %cst_35 [1] : vector<8x8xf32> to vector<8xf32>
    %166 = vector.shape_cast %165 : vector<8xf32> to vector<8x1xf32>
    %167 = tpu.reciprocal %166 {approx = true} : vector<8x1xf32> -> vector<8x1xf32>
    %168 = vector.broadcast %167 : vector<8x1xf32> to vector<8x8xf32>
    %169 = arith.mulf %164, %168 : vector<8x8xf32>
    %170 = arith.truncf %169 : vector<8x8xf32> to vector<8x8xbf16>
    %cst_36 = arith.constant dense<0.000000e+00> : vector<8x16xf32>
    %171 = tpu.matmul %170, %126, %cst_36 {dimension_numbers = #tpu.dot_dimension_numbers<[1], [0], [0], [1], [0, 0, 1, 1], [], []>} : vector<8x8xbf16>, vector<8x16xbf16>, vector<8x16xf32> -> vector<8x16xf32>
    %c8 = arith.constant 8 : index
    %c0_37 = arith.constant 0 : index
    %172 = vector.load %arg18[%c8, %c0_37] : memref<16x32xf32, #tpu.memory_space<vmem>>, vector<8x16xf32>
    tpu.vector_store %arg18[%c8, %c0_37], %171 {strides = array<i32>} : memref<16x32xf32, #tpu.memory_space<vmem>>, vector<8x16xf32>,
    %173 = vector.extract_strided_slice %2 {offsets = [8, 16], sizes = [8, 16], strides = [1, 1]} : vector<16x96xf32> to vector<8x16xf32>
    %174 = vector.extract_strided_slice %3 {offsets = [8, 48], sizes = [8, 16], strides = [1, 1]} : vector<16x96xbf16> to vector<8x16xbf16>
    %175 = vector.extract_strided_slice %3 {offsets = [8, 80], sizes = [8, 16], strides = [1, 1]} : vector<16x96xbf16> to vector<8x16xbf16>
    %176 = vector.extract_strided_slice %7 {offsets = [0, 16], sizes = [8, 16], strides = [1, 1]} : vector<8x32xbf16> to vector<8x16xbf16>
    %177 = vector.extract_strided_slice %9 {offsets = [1, 0], sizes = [1, 16], strides = [1, 1]} : vector<2x16xf32> to vector<1x16xf32>
    %178 = vector.broadcast %177 : vector<1x16xf32> to vector<8x16xf32>
    %179 = arith.addf %173, %178 : vector<8x16xf32>
    %180 = arith.truncf %179 : vector<8x16xf32> to vector<8x16xbf16>
    %181 = vector.extract_strided_slice %10 {offsets = [1, 0], sizes = [1, 16], strides = [1, 1]} : vector<2x16xf32> to vector<1x16xf32>
    %182 = vector.broadcast %181 : vector<1x16xf32> to vector<8x16xf32>
    %183 = arith.addf %173, %182 : vector<8x16xf32>
    %184 = arith.truncf %183 : vector<8x16xf32> to vector<8x16xbf16>
    %cst_38 = arith.constant dense<0.000000e+00> : vector<8x8xf32>
    %185 = tpu.matmul %180, %174, %cst_38 {dimension_numbers = #tpu.dot_dimension_numbers<[1], [1], [0], [0], [0, 0, 1, 0], [], []>} : vector<8x16xbf16>, vector<8x16xbf16>, vector<8x8xf32> -> vector<8x8xf32>
    %cst_39 = arith.constant dense<0.000000e+00> : vector<8x8xf32>
    %186 = tpu.matmul %184, %176, %cst_39 {dimension_numbers = #tpu.dot_dimension_numbers<[1], [1], [0], [0], [0, 0, 1, 0], [], []>} : vector<8x16xbf16>, vector<8x16xbf16>, vector<8x8xf32> -> vector<8x8xf32>
    %187 = vector.extract_strided_slice %186 {offsets = [0, 4], sizes = [8, 4], strides = [1, 1]} : vector<8x8xf32> to vector<8x4xf32>
    %188 = vector.extract_strided_slice %186 {offsets = [0, 0], sizes = [8, 4], strides = [1, 1]} : vector<8x8xf32> to vector<8x4xf32>
    %189 = tpu.concatenate %187, %188 in 1 : vector<8x4xf32>, vector<8x4xf32> -> vector<8x8xf32>
    %190 = vector.shape_cast %15 : vector<8x1xi1> to vector<8x1xi1>
    %191 = vector.broadcast %190 : vector<8x1xi1> to vector<8x8xi1>
    %192 = arith.select %191, %189, %186 : vector<8x8xi1>, vector<8x8xf32>
    %193 = vector.extract_strided_slice %192 {offsets = [0, 2], sizes = [8, 6], strides = [1, 1]} : vector<8x8xf32> to vector<8x6xf32>
    %194 = vector.extract_strided_slice %192 {offsets = [0, 0], sizes = [8, 2], strides = [1, 1]} : vector<8x8xf32> to vector<8x2xf32>
    %195 = tpu.concatenate %193, %194 in 1 : vector<8x6xf32>, vector<8x2xf32> -> vector<8x8xf32>
    %196 = vector.shape_cast %20 : vector<8x1xi1> to vector<8x1xi1>
    %197 = vector.broadcast %196 : vector<8x1xi1> to vector<8x8xi1>
    %198 = arith.select %197, %195, %192 : vector<8x8xi1>, vector<8x8xf32>
    %199 = vector.extract_strided_slice %198 {offsets = [0, 1], sizes = [8, 7], strides = [1, 1]} : vector<8x8xf32> to vector<8x7xf32>
    %200 = vector.extract_strided_slice %198 {offsets = [0, 0], sizes = [8, 1], strides = [1, 1]} : vector<8x8xf32> to vector<8x1xf32>
    %201 = tpu.concatenate %199, %200 in 1 : vector<8x7xf32>, vector<8x1xf32> -> vector<8x8xf32>
    %202 = vector.shape_cast %25 : vector<8x1xi1> to vector<8x1xi1>
    %203 = vector.broadcast %202 : vector<8x1xi1> to vector<8x8xi1>
    %204 = arith.select %203, %201, %198 : vector<8x8xi1>, vector<8x8xf32>
    %205 = arith.addf %185, %204 : vector<8x8xf32>
    %cst_40 = arith.constant 2.500000e-01 : f32
    %206 = vector.broadcast %cst_40 : f32 to vector<8x8xf32>
    %207 = arith.mulf %205, %206 : vector<8x8xf32>
    %208 = arith.addf %207, %8 : vector<8x8xf32>
    %cst_41 = arith.constant dense<0xFF800000> : vector<8xf32>
    %209 = vector.multi_reduction <maximumf>, %208, %cst_41 [1] : vector<8x8xf32> to vector<8xf32>
    %210 = vector.shape_cast %209 : vector<8xf32> to vector<8x1xf32>
    %211 = vector.broadcast %210 : vector<8x1xf32> to vector<8x8xf32>
    %212 = arith.subf %208, %211 : vector<8x8xf32>
    %213 = math.exp %212 : vector<8x8xf32>
    %cst_42 = arith.constant dense<0.000000e+00> : vector<8xf32>
    %214 = vector.multi_reduction <add>, %213, %cst_42 [1] : vector<8x8xf32> to vector<8xf32>
    %215 = vector.shape_cast %214 : vector<8xf32> to vector<8x1xf32>
    %216 = tpu.reciprocal %215 {approx = true} : vector<8x1xf32> -> vector<8x1xf32>
    %217 = vector.broadcast %216 : vector<8x1xf32> to vector<8x8xf32>
    %218 = arith.mulf %213, %217 : vector<8x8xf32>
    %219 = arith.truncf %218 : vector<8x8xf32> to vector<8x8xbf16>
    %cst_43 = arith.constant dense<0.000000e+00> : vector<8x16xf32>
    %220 = tpu.matmul %219, %175, %cst_43 {dimension_numbers = #tpu.dot_dimension_numbers<[1], [0], [0], [1], [0, 0, 1, 1], [], []>} : vector<8x8xbf16>, vector<8x16xbf16>, vector<8x16xf32> -> vector<8x16xf32>
    %c8_44 = arith.constant 8 : index
    %c16_45 = arith.constant 16 : index
    %221 = vector.load %arg18[%c8_44, %c16_45] : memref<16x32xf32, #tpu.memory_space<vmem>>, vector<8x16xf32>
    tpu.vector_store %arg18[%c8_44, %c16_45], %220 {strides = array<i32>} : memref<16x32xf32, #tpu.memory_space<vmem>>, vector<8x16xf32>,
    %c0_46 = arith.constant 0 : index
    %c0_47 = arith.constant 0 : index
    %222 = vector.load %arg18[%c0_46, %c0_47] : memref<16x32xf32, #tpu.memory_space<vmem>>, vector<16x32xf32>
    %223 = arith.truncf %222 : vector<16x32xf32> to vector<16x32xbf16>
    %c0_48 = arith.constant 0 : index
    %c0_49 = arith.constant 0 : index
    %224 = vector.load %arg8[%c0_48, %c0_49] : memref<32x32xbf16, #tpu.memory_space<vmem>>, vector<32x32xbf16>
    %cst_50 = arith.constant dense<0.000000e+00> : vector<16x32xf32>
    %225 = tpu.matmul %223, %224, %cst_50 {dimension_numbers = #tpu.dot_dimension_numbers<[1], [0], [0], [1], [0, 0, 1, 1], [], []>} : vector<16x32xbf16>, vector<32x32xbf16>, vector<16x32xf32> -> vector<16x32xf32>
    %226 = arith.extf %0 : vector<16x32xbf16> to vector<16x32xf32>
    %227 = arith.addf %226, %225 : vector<16x32xf32>
    %cst_51 = arith.constant dense<0.000000e+00> : vector<16xf32>
    %228 = vector.multi_reduction <add>, %227, %cst_51 [1] : vector<16x32xf32> to vector<16xf32>
    %229 = vector.shape_cast %228 : vector<16xf32> to vector<16x1xf32>
    %cst_52 = arith.constant 3.200000e+01 : f32
    %230 = vector.broadcast %cst_52 : f32 to vector<16x1xf32>
    %231 = arith.divf %229, %230 : vector<16x1xf32>
    %232 = vector.broadcast %231 : vector<16x1xf32> to vector<16x32xf32>
    %233 = arith.subf %227, %232 : vector<16x32xf32>
    %234 = arith.mulf %233, %233 : vector<16x32xf32>
    %cst_53 = arith.constant dense<0.000000e+00> : vector<16xf32>
    %235 = vector.multi_reduction <add>, %234, %cst_53 [1] : vector<16x32xf32> to vector<16xf32>
    %236 = vector.shape_cast %235 : vector<16xf32> to vector<16x1xf32>
    %cst_54 = arith.constant 3.200000e+01 : f32
    %237 = vector.broadcast %cst_54 : f32 to vector<16x1xf32>
    %238 = arith.divf %236, %237 : vector<16x1xf32>
    %239 = vector.broadcast %231 : vector<16x1xf32> to vector<16x32xf32>
    %240 = arith.subf %227, %239 : vector<16x32xf32>
    %cst_55 = arith.constant 9.99999974E-6 : f32
    %241 = vector.broadcast %cst_55 : f32 to vector<16x1xf32>
    %242 = arith.addf %238, %241 : vector<16x1xf32>
    %243 = math.rsqrt %242 : vector<16x1xf32>
    %244 = vector.broadcast %243 : vector<16x1xf32> to vector<16x32xf32>
    %245 = arith.mulf %240, %244 : vector<16x32xf32>
    %c0_56 = arith.constant 0 : index
    %c0_57 = arith.constant 0 : index
    %246 = vector.load %arg9[%c0_56, %c0_57] : memref<1x32xf32, #tpu.memory_space<vmem>>, vector<1x32xf32>
    %247 = vector.broadcast %246 : vector<1x32xf32> to vector<16x32xf32>
    %248 = arith.mulf %245, %247 : vector<16x32xf32>
    %c0_58 = arith.constant 0 : index
    %c0_59 = arith.constant 0 : index
    %249 = vector.load %arg10[%c0_58, %c0_59] : memref<1x32xf32, #tpu.memory_space<vmem>>, vector<1x32xf32>
    %250 = vector.broadcast %249 : vector<1x32xf32> to vector<16x32xf32>
    %251 = arith.addf %248, %250 : vector<16x32xf32>
    %252 = arith.truncf %251 : vector<16x32xf32> to vector<16x32xbf16>
    %c0_60 = arith.constant 0 : index
    %c0_61 = arith.constant 0 : index
    %253 = vector.load %arg11[%c0_60, %c0_61] : memref<32x64xbf16, #tpu.memory_space<vmem>>, vector<32x64xbf16>
    %cst_62 = arith.constant dense<0.000000e+00> : vector<16x64xf32>
    %254 = tpu.matmul %252, %253, %cst_62 {dimension_numbers = #tpu.dot_dimension_numbers<[1], [0], [0], [1], [0, 0, 1, 1], [], []>} : vector<16x32xbf16>, vector<32x64xbf16>, vector<16x64xf32> -> vector<16x64xf32>
    %c0_63 = arith.constant 0 : index
    %c0_64 = arith.constant 0 : index
    %255 = vector.load %arg12[%c0_63, %c0_64] : memref<1x64xf32, #tpu.memory_space<vmem>>, vector<1x64xf32>
    %256 = vector.broadcast %255 : vector<1x64xf32> to vector<16x64xf32>
    %257 = arith.addf %254, %256 : vector<16x64xf32>
    %cst_65 = arith.constant 0.000000e+00 : f32
    %258 = vector.broadcast %cst_65 : f32 to vector<16x64xf32>
    %259 = arith.maximumf %257, %258 : vector<16x64xf32>
    %260 = arith.truncf %259 : vector<16x64xf32> to vector<16x64xbf16>
    %c0_66 = arith.constant 0 : index
    %c0_67 = arith.constant 0 : index
    %261 = vector.load %arg13[%c0_66, %c0_67] : memref<64x32xbf16, #tpu.memory_space<vmem>>, vector<64x32xbf16>
    %cst_68 = arith.constant dense<0.000000e+00> : vector<16x32xf32>
    %262 = tpu.matmul %260, %261, %cst_68 {dimension_numbers = #tpu.dot_dimension_numbers<[1], [0], [0], [1], [0, 0, 1, 1], [], []>} : vector<16x64xbf16>, vector<64x32xbf16>, vector<16x32xf32> -> vector<16x32xf32>
    %c0_69 = arith.constant 0 : index
    %c0_70 = arith.constant 0 : index
    %263 = vector.load %arg14[%c0_69, %c0_70] : memref<1x32xf32, #tpu.memory_space<vmem>>, vector<1x32xf32>
    %264 = vector.broadcast %263 : vector<1x32xf32> to vector<16x32xf32>
    %265 = arith.addf %262, %264 : vector<16x32xf32>
    %266 = arith.addf %251, %265 : vector<16x32xf32>
    %cst_71 = arith.constant dense<0.000000e+00> : vector<16xf32>
    %267 = vector.multi_reduction <add>, %266, %cst_71 [1] : vector<16x32xf32> to vector<16xf32>
    %268 = vector.shape_cast %267 : vector<16xf32> to vector<16x1xf32>
    %cst_72 = arith.constant 3.200000e+01 : f32
    %269 = vector.broadcast %cst_72 : f32 to vector<16x1xf32>
    %270 = arith.divf %268, %269 : vector<16x1xf32>
    %271 = vector.broadcast %270 : vector<16x1xf32> to vector<16x32xf32>
    %272 = arith.subf %266, %271 : vector<16x32xf32>
    %273 = arith.mulf %272, %272 : vector<16x32xf32>
    %cst_73 = arith.constant dense<0.000000e+00> : vector<16xf32>
    %274 = vector.multi_reduction <add>, %273, %cst_73 [1] : vector<16x32xf32> to vector<16xf32>
    %275 = vector.shape_cast %274 : vector<16xf32> to vector<16x1xf32>
    %cst_74 = arith.constant 3.200000e+01 : f32
    %276 = vector.broadcast %cst_74 : f32 to vector<16x1xf32>
    %277 = arith.divf %275, %276 : vector<16x1xf32>
    %278 = vector.broadcast %270 : vector<16x1xf32> to vector<16x32xf32>
    %279 = arith.subf %266, %278 : vector<16x32xf32>
    %cst_75 = arith.constant 9.99999974E-6 : f32
    %280 = vector.broadcast %cst_75 : f32 to vector<16x1xf32>
    %281 = arith.addf %277, %280 : vector<16x1xf32>
    %282 = math.rsqrt %281 : vector<16x1xf32>
    %283 = vector.broadcast %282 : vector<16x1xf32> to vector<16x32xf32>
    %284 = arith.mulf %279, %283 : vector<16x32xf32>
    %c0_76 = arith.constant 0 : index
    %c0_77 = arith.constant 0 : index
    %285 = vector.load %arg15[%c0_76, %c0_77] : memref<1x32xf32, #tpu.memory_space<vmem>>, vector<1x32xf32>
    %286 = vector.broadcast %285 : vector<1x32xf32> to vector<16x32xf32>
    %287 = arith.mulf %284, %286 : vector<16x32xf32>
    %c0_78 = arith.constant 0 : index
    %c0_79 = arith.constant 0 : index
    %288 = vector.load %arg16[%c0_78, %c0_79] : memref<1x32xf32, #tpu.memory_space<vmem>>, vector<1x32xf32>
    %289 = vector.broadcast %288 : vector<1x32xf32> to vector<16x32xf32>
    %290 = arith.addf %287, %289 : vector<16x32xf32>
    %c0_80 = arith.constant 0 : index
    %c0_81 = arith.constant 0 : index
    %291 = vector.load %arg17[%c0_80, %c0_81] : memref<16x32xf32, #tpu.memory_space<vmem>>, vector<16x32xf32>
    tpu.vector_store %arg17[%c0_80, %c0_81], %290 {strides = array<i32>} : memref<16x32xf32, #tpu.memory_space<vmem>>, vector<16x32xf32>,
    return
  }
  func.func @transform_0(%arg0: i32) -> (i32, i32) {
    %c0_i32 = arith.constant 0 : i32
    %c0_i32_0 = arith.constant 0 : i32
    return %arg0, %c0_i32 : i32, i32
  }
  func.func @transform_1(%arg0: i32) -> (i32, i32) {
    %c0_i32 = arith.constant 0 : i32
    %c0_i32_0 = arith.constant 0 : i32
    %c0_i32_1 = arith.constant 0 : i32
    return %c0_i32, %c0_i32_0 : i32, i32
  }
  func.func @transform_2(%arg0: i32) -> (i32, i32) {
    %c0_i32 = arith.constant 0 : i32
    %c0_i32_0 = arith.constant 0 : i32
    %c0_i32_1 = arith.constant 0 : i32
    return %c0_i32, %c0_i32_0 : i32, i32
  }
  func.func @transform_3(%arg0: i32) -> (i32, i32) {
    %c0_i32 = arith.constant 0 : i32
    %c0_i32_0 = arith.constant 0 : i32
    %c0_i32_1 = arith.constant 0 : i32
    return %c0_i32, %c0_i32_0 : i32, i32
  }
  func.func @transform_4(%arg0: i32) -> (i32, i32) {
    %c0_i32 = arith.constant 0 : i32
    %c0_i32_0 = arith.constant 0 : i32
    %c0_i32_1 = arith.constant 0 : i32
    return %c0_i32, %c0_i32_0 : i32, i32
  }
  func.func @transform_5(%arg0: i32) -> (i32, i32) {
    %c0_i32 = arith.constant 0 : i32
    %c0_i32_0 = arith.constant 0 : i32
    %c0_i32_1 = arith.constant 0 : i32
    return %c0_i32, %c0_i32_0 : i32, i32
  }
  func.func @transform_6(%arg0: i32) -> (i32, i32) {
    %c0_i32 = arith.constant 0 : i32
    %c0_i32_0 = arith.constant 0 : i32
    %c0_i32_1 = arith.constant 0 : i32
    return %c0_i32, %c0_i32_0 : i32, i32
  }
  func.func @transform_7(%arg0: i32) -> (i32, i32) {
    %c0_i32 = arith.constant 0 : i32
    %c0_i32_0 = arith.constant 0 : i32
    %c0_i32_1 = arith.constant 0 : i32
    return %c0_i32, %c0_i32_0 : i32, i32
  }
  func.func @transform_8(%arg0: i32) -> (i32, i32) {
    %c0_i32 = arith.constant 0 : i32
    %c0_i32_0 = arith.constant 0 : i32
    %c0_i32_1 = arith.constant 0 : i32
    return %c0_i32, %c0_i32_0 : i32, i32
  }
  func.func @transform_9(%arg0: i32) -> (i32, i32) {
    %c0_i32 = arith.constant 0 : i32
    %c0_i32_0 = arith.constant 0 : i32
    %c0_i32_1 = arith.constant 0 : i32
    return %c0_i32, %c0_i32_0 : i32, i32
  }
  func.func @transform_10(%arg0: i32) -> (i32, i32) {
    %c0_i32 = arith.constant 0 : i32
    %c0_i32_0 = arith.constant 0 : i32
    %c0_i32_1 = arith.constant 0 : i32
    return %c0_i32, %c0_i32_0 : i32, i32
  }
  func.func @transform_11(%arg0: i32) -> (i32, i32) {
    %c0_i32 = arith.constant 0 : i32
    %c0_i32_0 = arith.constant 0 : i32
    %c0_i32_1 = arith.constant 0 : i32
    return %c0_i32, %c0_i32_0 : i32, i32
  }
  func.func @transform_12(%arg0: i32) -> (i32, i32) {
    %c0_i32 = arith.constant 0 : i32
    %c0_i32_0 = arith.constant 0 : i32
    %c0_i32_1 = arith.constant 0 : i32
    return %c0_i32, %c0_i32_0 : i32, i32
  }
  func.func @transform_13(%arg0: i32) -> (i32, i32) {
    %c0_i32 = arith.constant 0 : i32
    %c0_i32_0 = arith.constant 0 : i32
    %c0_i32_1 = arith.constant 0 : i32
    return %c0_i32, %c0_i32_0 : i32, i32
  }
  func.func @transform_14(%arg0: i32) -> (i32, i32) {
    %c0_i32 = arith.constant 0 : i32
    %c0_i32_0 = arith.constant 0 : i32
    %c0_i32_1 = arith.constant 0 : i32
    return %c0_i32, %c0_i32_0 : i32, i32
  }
  func.func @transform_15(%arg0: i32) -> (i32, i32) {
    %c0_i32 = arith.constant 0 : i32
    %c0_i32_0 = arith.constant 0 : i32
    %c0_i32_1 = arith.constant 0 : i32
    return %c0_i32, %c0_i32_0 : i32, i32
  }
  func.func @transform_16(%arg0: i32) -> (i32, i32) {
    %c0_i32 = arith.constant 0 : i32
    %c0_i32_0 = arith.constant 0 : i32
    return %arg0, %c0_i32 : i32, i32
  }
}

</mosaic_0001>

<bundles_post_ra>
// kernel: tpu_custom_call.1
= control target key start
LH: loop header
LB: loop body
LE: loop exit
PB: predicated region body
PF: predicated region fallthrough
CT: control target
= control target key end

     0   :  { %s1647_s0 = inlined_call_operand.hbm [shape: bf16[16,32], index: 0, kind: input, shape index: {}]   ;;  %s1648_s1 = inlined_call_operand.hbm [shape: bf16[8,32], index: 1, kind: input, shape index: {}]   ;;  %s1649_s2 = inlined_call_operand.hbm [shape: f32[8,8], index: 2, kind: input, shape index: {}]   ;;  %s1650_s3 = inlined_call_operand.vmem [shape: f32[2,16], index: 3, kind: input, shape index: {}]   ;;  %s1651_s4 = inlined_call_operand.hbm [shape: f32[2,16], index: 4, kind: input, shape index: {}]   ;;  %s1652_s5 = inlined_call_operand.vmem [shape: bf16[32,96], index: 5, kind: input, shape index: {}]   ;;  %s1653_s6 = inlined_call_operand.vmem [shape: bf16[32,32], index: 6, kind: input, shape index: {}]   ;;  %s1654_s7 = inlined_call_operand.vmem [shape: bf16[32,32], index: 7, kind: input, shape index: {}]   ;;  %s1655_s8 = inlined_call_operand.vmem [shape: f32[1,32], index: 8, kind: input, shape index: {}]   ;;  %s1656_s9 = inlined_call_operand.vmem [shape: f32[1,32], index: 9, kind: input, shape index: {}]   ;;  %s1657_s10 = inlined_call_operand.hbm [shape: bf16[32,64], index: 10, kind: input, shape index: {}]   ;;  %s1658_s11 = inlined_call_operand.vmem [shape: f32[1,64], index: 11, kind: input, shape index: {}]   ;;  %s1659_s12 = inlined_call_operand.vmem [shape: bf16[64,32], index: 12, kind: input, shape index: {}]   ;;  %s1660_s13 = inlined_call_operand.vmem [shape: f32[1,32], index: 13, kind: input, shape index: {}]   ;;  %s1661_s14 = inlined_call_operand.vmem [shape: f32[1,32], index: 14, kind: input, shape index: {}]   ;;  %s1662_s15 = inlined_call_operand.vmem [shape: f32[1,32], index: 15, kind: input, shape index: {}]   ;;  %s1663_s16 = inlined_call_operand.hbm [shape: f32[16,32], index: 16, kind: output, shape index: {}]  }
   0x1   :  { %1664 = sst [smem:[#allocation17_spill]] %s1647_s0 }
   0x2   :  { %21 = vsyncpa [#allocation4], 0 }
   0x3   :  { %22 = vsyncpa [#allocation7], 0 }
   0x4   :  { %23 = vsyncpa [#allocation10], 0  ;;  %s43_s23 = sshll.u32 %s1648_s1, 4  ;;  %s44_s23 = int_to_ptr.hbm [resolvable:$true] %s43_s23 }
   0x5   :  { %24 = vsyncpa [#allocation5], 0  ;;  %s1263_s24 = smov [#allocation6]   ;;  %s67_s28 = sshll.u32 %s1651_s4, 4  ;;  %s68_s28 = int_to_ptr.hbm [resolvable:$true] %s67_s28 }
   0x6   :  { %s45_s25 = sshll.u32 %s1263_s24, 4  ;;  %s1264_s29 = smov [#allocation9]   ;;  %s46_s25 = int_to_ptr.vmem [resolvable:$true] %s45_s25 }
   0x7   :  { %48 = dma.hbm_to_vmem [thread:$0]  %s44_s23, 64, %s46_s25, [#allocation7]  }
   0x8   :  { %s69_s30 = sshll.u32 %s1264_s29, 4  ;;  %s1665_s18 = sld [smem:[#allocation17_spill]]  ;;  %s70_s30 = int_to_ptr.vmem [resolvable:$true] %s69_s30 }
   0x9   :  { %72 = dma.hbm_to_vmem [thread:$0]  %s68_s28, 32, %s70_s30, [#allocation10]  }
   0xa   :  { %s1265_s1 = smov [#allocation3]   ;;  %s54_s24 = sshll.u32 %s1649_s2, 4  ;;  %s55_s24 = int_to_ptr.hbm [resolvable:$true] %s54_s24 }
   0xb   :  { %s31_s20 = sshll.u32 %s1265_s1, 4  ;;  %s1266_s26 = smov 64   ;;  %s32_s20 = int_to_ptr.vmem [resolvable:$true] %s31_s20 }
   0xc   :  { %s1267_s4 = smov 4   ;;  %s1268_s23 = smov [#allocation8]  }
   0xd   :  { %s56_s25 = sshll.u32 %s1268_s23, 4  ;;  %s87_s28 = sshll.u32 %s1657_s10, 4  ;;  %s57_s25 = int_to_ptr.vmem [resolvable:$true] %s56_s25  ;;  %s88_s28 = int_to_ptr.hbm [resolvable:$true] %s87_s28 }
   0xe   :  { %s29_s19 = sshll.u32 %s1665_s18, 4  ;;  %s1269_s30 = smov [#allocation11]   ;;  %s30_s19 = int_to_ptr.hbm [resolvable:$true] %s29_s19 }
   0xf   :  { %37 = dma.hbm_to_vmem [thread:$0]  %s30_s19, 128, %s32_s20, [#allocation4], %s1266_s26, %s1266_s26, %s1267_s4  }
  0x10   :  { %59 = dma.hbm_to_vmem [thread:$0]  %s55_s24, 128, %s57_s25, [#allocation7]  }
  0x11   :  { %s89_s0 = sshll.u32 %s1269_s30, 4  ;;  %s90_s0 = int_to_ptr.vmem [resolvable:$true] %s89_s0 }
  0x12   :  { %95 = dma.hbm_to_vmem [thread:$0]  %s88_s28, 256, %s90_s0, [#allocation10], %s1266_s26, %s1266_s26, %s1267_s4  }
  0x13   :  { %1255 = dma.done.wait [#allocation4], 128  }
  0x14   :  { %1256 = vsyncadd [#allocation4], 4294967168 }
  0x15   :  { %1257 = dma.done.wait [#allocation7], 192  }
  0x16   :  { %1258 = vsyncadd [#allocation7], 4294967104 }
  0x17   :  { %1259 = dma.done.wait [#allocation10], 288  }
  0x18   :  { %1260 = vsyncadd [#allocation10], 4294967008  ;;  %v1047_v0 = vld [vmem:[%s1652_s5 + $0x8] sm:$0xff]  ;;  %v1046_v2 = vld [vmem:[%s1652_s5] sm:$0xff]  ;;  %s1270_s22 = smov 16   ;;  %vm150_vm0 = vcmask 261120   ;;  %v207_v47 = vlaneseq }
  0x19   :  { %v1049_v1 = vld [vmem:[%s1653_s6 + $0x8] sm:$0xff]  ;;  %v1048_v3 = vld [vmem:[%s1653_s6] sm:$0xff]  ;;  %160 = vmatpush.bf16.msra.mxu0 %v1047_v0  ;;  %v1045_v6 = vld [vmem:[#allocation3] sm:$0xff]  ;;  %vm223_vm1 = vcmask 130048   ;;  %s1271_s5 = smov 112   ;;  %s1272_s6 = smov 80  }
  0x1a   :  { %196 = vmatpush.bf16.msra.mxu1 %v1049_v1  ;;  %v1402_v4 = vld [vmem:[#allocation9] sm:$0x3]  ;;  %v170_v7 = vld [vmem:[#allocation6] sm:$0xf]  ;;  %v1427_v24 = vld [vmem:[%s1650_s3] sm:$0x3] }
  0x1b   :  { %v348_v5 = vperm.slane %v1402_v4, 1  ;;  %v220_v8 = vperm.slane %v1402_v4, 0  ;;  %v341_v25 = vperm.slane %v1427_v24, 1  ;;  %s1273_s25 = smov 96   ;;  %v217_v32 = vperm.slane %v1427_v24, 0  ;;  %s1274_s3 = smov 124  }
  0x1c   :  { %v208_v48 = vshrl.u32 %v207_v47, 7  ;;  %vm250_vm2 = vcmask 31744   ;;  %s1275_s27 = smov 6   ;;  %s1276_s29 = smov 126   ;;  %vm262_vm4 = vcmask 48128   ;;  %vm274_vm6 = vcmask 56320  }
  0x1d   :  { %350 = vrot.lane.b32.xlu0 %v348_v5, %s1270_s22  ;;  %161 = vmatpush.bf16.msra.mxu0 %v1046_v2  ;;  %s1277_s28 = smov 7   ;;  %s1278_s30 = smov 127   ;;  %vm305_vm8 = vcmask 64512   ;;  %vm323_vm9 = vcmask 1043456   ;;  %vm472_vm10 = vcmask 261248  }
  0x1e   :  { %197 = vmatpush.bf16.msra.mxu1 %v1048_v3  ;;  %v1454_v50 = vsub.s32 7, %v208_v48  ;;  %s1279_s0 = smov 48  }
  0x20   :  { %986 = vmatmul.msk.bf16.vlgmr.msra.gmra.mxu0 %vm150_vm0, %v1045_v6  ;;  %vm210_vm3 = vcmp.ge.s32.totalorder %v1454_v50, 4  ;;  %v996_v59 = vadd.s32 4294967292, %v1454_v50 }
  0x21   :  { %995 = vmatmul.msk.bf16.vlgmr.msra.gmra.mxu1 %vm150_vm0, %v170_v7 }
  0x22   :  { %v1471_v60 = vsel %vm210_vm3, %v996_v59, %v1454_v50 }
  0x23   :  { %vm213_vm5 = vcmp.ge.s32.totalorder %v1471_v60, 2  ;;  %v997_v6 = vadd.s32 4294967294, %v1471_v60 }
  0x25   :  { %v1488_v7 = vsel %vm213_vm5, %v997_v6, %v1471_v60 }
  0x26   :  { %vm216_vm7 = vcmp.ge.s32.totalorder %v1488_v7, 1 }
  0x8f   :  { %v1409_v9 = vpop.permute.xlu0 %350 }
  0x9d   :  { %v163_v10 = vpop.f32.mrf.mxu0 }
  0x9e   :  { %v199_v11 = vpop.f32.mrf.mxu1  ;;  %v353_v13 = vadd.f32 %v1409_v9, %v163_v10  ;;  %v168_v14 = vpack.c.bf16 %v163_v10, %v163_v10  ;;  %v221_v15 = vadd.f32 %v220_v8, %v163_v10  ;;  %v218_v37 = vadd.f32 %v217_v32, %v163_v10 }
  0x9f   :  { %v203_v12 = vpack.c.bf16 %v199_v11, %v199_v11 }
  0xa0   :  { %v354_v18 = vpack.c.bf16 %v353_v13, %v353_v13  ;;  %v280_v19 = vunpack.c.l.b16 %v168_v14  ;;  %v222_v22 = vpack.c.bf16 %v221_v15, %v221_v15  ;;  %v219_v38 = vpack.c.bf16 %v218_v37, %v218_v37  ;;  %v1494_v15 = vld [vmem:[#allocation8] sm:$0xff] }
  0xa1   :  { %v359_v16 = vunpack.c.l.b16 %v203_v12  ;;  %v1415_v17 = vsel %vm223_vm1, %v203_v12, 0 }
  0xa2   :  { %237 = vmatpush.bf16.xpose.msra.mxu2 %v1415_v17  ;;  %356 = vrot.lane.b32.xlu1 %v354_v18, %s1271_s5  ;;  %v1419_v21 = vpack.c.b16 %v280_v19, %v280_v19 }
  0xa3   :  { %v360_v20 = vpack.c.b16 %v359_v16, %v359_v16 }
  0xa4   :  { %412 = vrot.lane.b32.xlu2 %v1419_v21, %s1272_s6 }
  0xa5   :  { %361 = vrot.lane.b32.xlu0 %v360_v20, %s1271_s5 }
  0xa6   :  { %v201_v23 = vpop.f32.mrf.mxu1 }
  0xa9   :  { %998 = vmatmul.msk.bf16.vlgmr.msra.gmra.mxu2 %vm223_vm1, %v222_v22 }
  0xaa   :  { %343 = vrot.lane.b32.xlu1 %v341_v25, %s1270_s22 }
  0xad   :  { %282 = vrot.lane.b32.xlu0 %v1419_v21, %s1273_s25 }
  0xfe   :  { %v413_v26 = vpop.permute.xlu2 %412 }
  0xff   :  { %v418_v27 = vsel %vm223_vm1, %v413_v26, 0 }
 0x100   :  { %427 = vmatpush.bf16.xpose.msrb.mxu2 %v418_v27 }
 0x114   :  { %v357_v28 = vpop.permute.xlu1 %356 }
 0x117   :  { %v362_v29 = vpop.permute.xlu0 %361 }
 0x118   :  { %v1436_v30 = vsel %vm223_vm1, %v362_v29, 0 }
 0x119   :  { %376 = vmatpush.bf16.xpose.msrb.mxu1 %v1436_v30 }
 0x11c   :  { %v1439_v31 = vpop.permute.xlu1 %343 }
 0x11d   :  { %v346_v33 = vadd.f32 %v1439_v31, %v163_v10 }
 0x11f   :  { %v283_v34 = vpop.permute.xlu0 %282  ;;  %v347_v35 = vpack.c.bf16 %v346_v33, %v346_v33  ;;  %v165_v33 = vpop.f32.mrf.mxu0 }
 0x120   :  { %1001 = vmatmul.msk.bf16.vlgmr.msrb.gmra.mxu1 %vm223_vm1, %v357_v28  ;;  %v288_v36 = vsel %vm223_vm1, %v283_v34, 0  ;;  %v583_v34 = vadd.f32 %v1409_v9, %v165_v33  ;;  %v169_v37 = vpack.c.bf16 %v165_v33, %v165_v33 }
 0x121   :  { %297 = vmatpush.bf16.xpose.msra.mxu3 %v288_v36  ;;  %410 = vrot.lane.b32.xlu2 %v347_v35, %s1271_s5  ;;  %v581_v36 = vadd.f32 %v1439_v31, %v165_v33 }
 0x122   :  { %v584_v35 = vpack.c.bf16 %v583_v34, %v583_v34 }
 0x128   :  { %999 = vmatmul.msk.bf16.vlgmr.msra.gmra.mxu3 %vm223_vm1, %v219_v38  ;;  %v582_v38 = vpack.c.bf16 %v581_v36, %v581_v36 }
 0x12c   :  { %v239_v39 = vpop.f32.mrf.mxu2 }
 0x12d   :  { %244 = vrot.lane.b32.xlu0 %v239_v39, %s1274_s3 }
 0x134   :  { %v241_v40 = vpop.f32.mrf.mxu2 }
 0x17b   :  { %v411_v41 = vpop.permute.xlu2 %410 }
 0x17c   :  { %1002 = vmatmul.msk.bf16.vlgmr.msrb.gmra.mxu2 %vm223_vm1, %v411_v41 }
 0x19d   :  { %v378_v42 = vpop.f32.mrf.mxu1 }
 0x19e   :  { %383 = vrot.lane.b32.xlu1 %v378_v42, %s1274_s3  ;;  %386 = vrot.lane.b32.xlu2 %v378_v42, %s1267_s4 }
 0x19f   :  { %v245_v55 = vpop.permute.xlu0 %244 }
 0x1a5   :  { %v380_v43 = vpop.f32.mrf.mxu1 }
 0x1a6   :  { %247 = vrot.lane.b32.xlu1 %v239_v39, %s1267_s4 }
 0x1ab   :  { %v299_v44 = vpop.f32.mrf.mxu3 }
 0x1b3   :  { %v301_v45 = vpop.f32.mrf.mxu3 }
 0x1f8   :  { %v387_v51 = vpop.permute.xlu2 %386 }
 0x1ff   :  { %v429_v46 = vpop.f32.mrf.mxu2 }
 0x207   :  { %v431_v49 = vpop.f32.mrf.mxu2 }
 0x210   :  { %v384_v52 = vpop.permute.xlu1 %383 }
 0x211   :  { %v389_v53 = vsel %vm250_vm2, %v384_v52, %v387_v51 }
 0x212   :  { %v390_v54 = vsel %vm210_vm3, %v389_v53, %v378_v42 }
 0x213   :  { %395 = vrot.lane.b32.xlu0 %v390_v54, %s1275_s27  ;;  %392 = vrot.lane.b32.xlu2 %v390_v54, %s1276_s29 }
 0x218   :  { %v248_v56 = vpop.permute.xlu1 %247 }
 0x219   :  { %v251_v57 = vsel %vm250_vm2, %v245_v55, %v248_v56  ;;  %v474_v55 = vadd.f32 %v217_v32, %v165_v33 }
 0x21a   :  { %v254_v58 = vsel %vm210_vm3, %v251_v57, %v239_v39  ;;  %v522_v39 = vunpack.c.l.b16 %v169_v37 }
 0x21b   :  { %256 = vrot.lane.b32.xlu1 %v254_v58, %s1276_s29  ;;  %259 = vrot.lane.b32.xlu2 %v254_v58, %s1275_s27  ;;  %v475_v56 = vpack.c.bf16 %v474_v55, %v474_v55 }
 0x21c   :  { %v1509_v40 = vpack.c.b16 %v522_v39, %v522_v39 }
 0x26d   :  { %v393_v61 = vpop.permute.xlu2 %392 }
 0x275   :  { %v260_v1 = vpop.permute.xlu2 %259 }
 0x285   :  { %v396_v62 = vpop.permute.xlu0 %395 }
 0x286   :  { %v398_v63 = vsel %vm262_vm4, %v393_v61, %v396_v62 }
 0x287   :  { %v399_v0 = vsel %vm213_vm5, %v398_v63, %v390_v54 }
 0x288   :  { %404 = vrot.lane.b32.xlu1 %v399_v0, %s1277_s28  ;;  %401 = vrot.lane.b32.xlu0 %v399_v0, %s1278_s30 }
 0x28d   :  { %v257_v2 = vpop.permute.xlu1 %256 }
 0x28e   :  { %v263_v3 = vsel %vm262_vm4, %v257_v2, %v260_v1 }
 0x28f   :  { %v266_v5 = vsel %vm213_vm5, %v263_v3, %v254_v58  ;;  %v476_v3 = vadd.f32 %v220_v8, %v165_v33 }
 0x290   :  { %271 = vrot.lane.b32.xlu0 %v266_v5, %s1277_s28  ;;  %268 = vrot.lane.b32.xlu2 %v266_v5, %s1278_s30 }
 0x2ea   :  { %v269_v19 = vpop.permute.xlu2 %268 }
 0x2fa   :  { %v405_v10 = vpop.permute.xlu1 %404  ;;  %v402_v11 = vpop.permute.xlu0 %401 }
 0x2fb   :  { %v407_v12 = vsel %vm274_vm6, %v402_v11, %v405_v10 }
 0x2fc   :  { %v408_v13 = vsel %vm216_vm7, %v407_v12, %v399_v0 }
 0x2fd   :  { %v430_v14 = vadd.f32 %v429_v46, %v408_v13 }
 0x2ff   :  { %v433_v16 = vmul.f32 0.25, %v430_v14 }
 0x301   :  { %v434_v18 = vadd.f32 %v433_v16, %v1494_v15 }
 0x302   :  { %v272_v20 = vpop.permute.xlu0 %271 }
 0x303   :  { %v275_v22 = vsel %vm274_vm6, %v269_v19, %v272_v20  ;;  %v435_v23 = vsel %vm305_vm8, %v434_v18, -inf }
 0x304   :  { %v278_v25 = vsel %vm216_vm7, %v275_v22, %v266_v5  ;;  %436 = vmax.xlane.f32.xlu1 %v435_v23  ;;  %v477_v5 = vpack.c.bf16 %v476_v3, %v476_v3 }
 0x305   :  { %v300_v26 = vadd.f32 %v299_v44, %v278_v25 }
 0x307   :  { %v303_v27 = vmul.f32 0.25, %v300_v26 }
 0x309   :  { %v304_v28 = vadd.f32 %v303_v27, %v1494_v15 }
 0x30b   :  { %v306_v29 = vsel %vm305_vm8, %v304_v28, -inf }
 0x30c   :  { %307 = vmax.xlane.f32.xlu2 %v306_v29 }
 0x31d   :  { %586 = vrot.lane.b32.xlu1 %v584_v35, %s1271_s5 }
 0x324   :  { %447 = vrot.lane.b32.xlu2 %v1419_v21, %s1279_s0 }
 0x325   :  { %632 = vrot.lane.b32.xlu1 %v582_v38, %s1271_s5 }
 0x32c   :  { %634 = vrot.lane.b32.xlu2 %v1509_v40, %s1272_s6 }
 0x334   :  { %524 = vrot.lane.b32.xlu2 %v1509_v40, %s1273_s25 }
 0x377   :  { %v437_v9 = vpop.xlane.xlu1 %436 }
 0x378   :  { %v438_v41 = vsub.f32 %v434_v18, %v437_v9 }
 0x37a   :  { %v439_v31 = vmul.f32 1.442695, %v438_v41 }
 0x37c   :  { %1085 = vpow2.f32 %v439_v31 }
 0x37f   :  { %v308_v42 = vpop.xlane.xlu2 %307 }
 0x380   :  { %v309_v43 = vsub.f32 %v304_v28, %v308_v42 }
 0x382   :  { %v1086_v44 = vpop.eup %1085  ;;  %v310_v45 = vmul.f32 1.442695, %v309_v43 }
 0x383   :  { %v441_v46 = vsel %vm305_vm8, %v1086_v44, 0.0 }
 0x384   :  { %1087 = vpow2.f32 %v310_v45  ;;  %442 = vadd.xlane.f32.xlu0 %v441_v46 }
 0x387   :  { %v448_v47 = vpop.permute.xlu2 %447 }
 0x388   :  { %v453_v48 = vsel %vm323_vm9, %v448_v47, 0 }
 0x389   :  { %462 = vmatpush.bf16.msrb.mxu3 %v453_v48 }
 0x38a   :  { %v1088_v49 = vpop.eup %1087 }
 0x38b   :  { %v312_v51 = vsel %vm305_vm8, %v1088_v49, 0.0 }
 0x38c   :  { %313 = vadd.xlane.f32.xlu0 %v312_v51 }
 0x38d   :  { %598 = vmatpush.bf16.xpose.msra.mxu3 %v1436_v30 }
 0x38f   :  { %v635_v52 = vpop.permute.xlu2 %634  ;;  %v587_v0 = vpop.permute.xlu1 %586 }
 0x390   :  { %v640_v1 = vsel %vm223_vm1, %v635_v52, 0 }
 0x397   :  { %v525_v53 = vpop.permute.xlu2 %524  ;;  %v633_v10 = vpop.permute.xlu1 %632 }
 0x398   :  { %v530_v54 = vsel %vm223_vm1, %v525_v53, 0 }
 0x399   :  { %539 = vmatpush.bf16.xpose.msra.mxu1 %v530_v54 }
 0x3a0   :  { %318 = vrot.lane.b32.xlu0 %v1419_v21, %s1266_s26  ;;  %1005 = vmatmul.msk.bf16.vlgmr.msra.gmra.mxu1 %vm223_vm1, %v475_v56 }
 0x3f7   :  { %v443_v57 = vpop.xlane.xlu0 %442 }
 0x3f8   :  { %1089 = vrcp.f32 %v443_v57 }
 0x3fe   :  { %v1090_v30 = vpop.eup %1089 }
 0x3ff   :  { %v445_v58 = vmul.f32 %v1090_v30, %v1086_v44  ;;  %v314_v61 = vpop.xlane.xlu0 %313 }
 0x400   :  { %1091 = vrcp.f32 %v314_v61 }
 0x401   :  { %v446_v59 = vpack.c.bf16 %v445_v58, %v445_v58 }
 0x403   :  { %1003 = vmatmul.msk.bf16.vlgmr.msrb.gmra.mxu3 %vm305_vm8, %v446_v59 }
 0x406   :  { %v1092_v62 = vpop.eup %1091 }
 0x407   :  { %v316_v63 = vmul.f32 %v1092_v62, %v1088_v49 }
 0x409   :  { %v317_v21 = vpack.c.bf16 %v316_v63, %v316_v63 }
 0x412   :  { %v319_v24 = vpop.permute.xlu0 %318 }
 0x413   :  { %1007 = vmatmul.msk.bf16.vlgmr.msra.gmra.mxu3 %vm223_vm1, %v587_v0  ;;  %v325_v32 = vsel %vm323_vm9, %v319_v24, 0 }
 0x414   :  { %334 = vmatpush.bf16.msrb.mxu0 %v325_v32 }
 0x417   :  { %1000 = vmatmul.msk.bf16.vlgmr.msrb.gmra.mxu0 %vm305_vm8, %v317_v21 }
 0x418   :  { %488 = vmatpush.bf16.xpose.msra.mxu0 %v1415_v17 }
 0x41d   :  { %v541_v2 = vpop.f32.mrf.mxu1 }
 0x420   :  { %649 = vmatpush.bf16.xpose.msrb.mxu0 %v640_v1 }
 0x425   :  { %v543_v6 = vpop.f32.mrf.mxu1 }
 0x427   :  { %1004 = vmatmul.msk.bf16.vlgmr.msra.gmra.mxu0 %vm223_vm1, %v477_v5 }
 0x437   :  { %1008 = vmatmul.msk.bf16.vlgmr.msrb.gmra.mxu0 %vm223_vm1, %v633_v10 }
 0x486   :  { %v1535_v11 = vpop.f32.mrf.mxu3 }
 0x48e   :  { %v466_v17 = vpop.f32.mrf.mxu3 }
 0x494   :  { %v336_v12 = vpop.f32.mrf.mxu0 }
 0x495   :  { %340 = vst.msk [vmem:[#allocation2] sm:$0xff] %vm223_vm1, %v336_v12 }
 0x496   :  { %v600_v13 = vpop.f32.mrf.mxu3 }
 0x497   :  { %608 = vrot.lane.b32.xlu0 %v600_v13, %s1267_s4  ;;  %605 = vrot.lane.b32.xlu1 %v600_v13, %s1274_s3 }
 0x49c   :  { %v338_v4 = vpop.f32.mrf.mxu0 }
 0x49e   :  { %v602_v8 = vpop.f32.mrf.mxu3 }
 0x49f   :  { %v1051_v8 = vld [vmem:[%s1654_s7 + $0x8] sm:$0xff] }
 0x4a4   :  { %v490_v14 = vpop.f32.mrf.mxu0 }
 0x4a5   :  { %498 = vrot.lane.b32.xlu1 %v490_v14, %s1267_s4  ;;  %495 = vrot.lane.b32.xlu2 %v490_v14, %s1274_s3 }
 0x4ac   :  { %v492_v16 = vpop.f32.mrf.mxu0 }
 0x4b4   :  { %v651_v18 = vpop.f32.mrf.mxu0 }
 0x4bc   :  { %v653_v19 = vpop.f32.mrf.mxu0 }
 0x4ff   :  { %v496_v26 = vpop.permute.xlu2 %495 }
 0x509   :  { %v609_v20 = vpop.permute.xlu0 %608  ;;  %v606_v22 = vpop.permute.xlu1 %605 }
 0x50a   :  { %v611_v23 = vsel %vm250_vm2, %v606_v22, %v609_v20  ;;  %v127_v22 = vld [vmem:[#allocation3] sm:$0xff]  }
 0x50b   :  { %v612_v25 = vsel %vm210_vm3, %v611_v23, %v600_v13  ;;  %v731_v23 = vunpack.c.l.bf16 %v127_v22 }
 0x50c   :  { %614 = vrot.lane.b32.xlu0 %v612_v25, %s1276_s29  ;;  %617 = vrot.lane.b32.xlu2 %v612_v25, %s1275_s27 }
 0x517   :  { %v499_v27 = vpop.permute.xlu1 %498 }
 0x518   :  { %v501_v28 = vsel %vm250_vm2, %v496_v26, %v499_v27 }
 0x519   :  { %v502_v29 = vsel %vm210_vm3, %v501_v28, %v490_v14  ;;  %v1050_v14 = vld [vmem:[%s1654_s7] sm:$0xff]  ;;  %v732_v28 = vunpack.c.h.bf16 %v127_v22  ;;  %vm875_vm3 = vcmask 523264  }
 0x51a   :  { %507 = vrot.lane.b32.xlu0 %v502_v29, %s1275_s27  ;;  %504 = vrot.lane.b32.xlu1 %v502_v29, %s1276_s29 }
 0x566   :  { %v618_v33 = vpop.permute.xlu2 %617 }
 0x57e   :  { %v615_v34 = vpop.permute.xlu0 %614 }
 0x57f   :  { %v620_v35 = vsel %vm262_vm4, %v615_v34, %v618_v33 }
 0x580   :  { %v621_v36 = vsel %vm213_vm5, %v620_v35, %v612_v25  ;;  %v1280_v35 = vmov 32.0  }
 0x581   :  { %626 = vrot.lane.b32.xlu1 %v621_v36, %s1277_s28  ;;  %623 = vrot.lane.b32.xlu2 %v621_v36, %s1278_s30 }
 0x58c   :  { %v508_v37 = vpop.permute.xlu0 %507  ;;  %v505_v38 = vpop.permute.xlu1 %504 }
 0x58d   :  { %v510_v50 = vsel %vm262_vm4, %v505_v38, %v508_v37 }
 0x58e   :  { %v511_v39 = vsel %vm213_vm5, %v510_v50, %v502_v29 }
 0x58f   :  { %513 = vrot.lane.b32.xlu0 %v511_v39, %s1278_s30  ;;  %516 = vrot.lane.b32.xlu2 %v511_v39, %s1277_s28 }
 0x5db   :  { %v624_v9 = vpop.permute.xlu2 %623 }
 0x5e9   :  { %v517_v60 = vpop.permute.xlu2 %516 }
 0x5f3   :  { %v627_v41 = vpop.permute.xlu1 %626 }
 0x5f4   :  { %v629_v31 = vsel %vm274_vm6, %v624_v9, %v627_v41 }
 0x5f5   :  { %v630_v42 = vsel %vm216_vm7, %v629_v31, %v621_v36 }
 0x5f6   :  { %v652_v43 = vadd.f32 %v651_v18, %v630_v42 }
 0x5f8   :  { %v655_v44 = vmul.f32 0.25, %v652_v43 }
 0x5fa   :  { %v656_v45 = vadd.f32 %v655_v44, %v1494_v15 }
 0x5fc   :  { %v657_v46 = vsel %vm305_vm8, %v656_v45, -inf }
 0x5fd   :  { %658 = vmax.xlane.f32.xlu1 %v657_v46 }
 0x601   :  { %v514_v47 = vpop.permute.xlu0 %513 }
 0x602   :  { %v519_v48 = vsel %vm274_vm6, %v514_v47, %v517_v60 }
 0x603   :  { %v520_v49 = vsel %vm216_vm7, %v519_v48, %v511_v39 }
 0x604   :  { %v542_v51 = vadd.f32 %v541_v2, %v520_v49  ;;  %v1053_v49 = vld [vmem:[#allocation11 + $0x8] sm:$0xff] }
 0x605   :  { %828 = vmatpush.bf16.msrb.mxu3 %v1053_v49 }
 0x606   :  { %v545_v52 = vmul.f32 0.25, %v542_v51 }
 0x608   :  { %v546_v53 = vadd.f32 %v545_v52, %v1494_v15 }
 0x60a   :  { %v547_v54 = vsel %vm305_vm8, %v546_v53, -inf }
 0x60b   :  { %548 = vmax.xlane.f32.xlu0 %v547_v54 }
 0x616   :  { %669 = vrot.lane.b32.xlu1 %v1509_v40, %s1279_s0  ;;  %s959_s0 = sshll.u32 %s1663_s16, 4  ;;  %s960_s0 = int_to_ptr.hbm [resolvable:$true] %s959_s0 }
 0x670   :  { %v659_v55 = vpop.xlane.xlu1 %658 }
 0x671   :  { %v660_v56 = vsub.f32 %v656_v45, %v659_v55 }
 0x673   :  { %v661_v57 = vmul.f32 1.442695, %v660_v56 }
 0x675   :  { %1093 = vpow2.f32 %v661_v57 }
 0x67b   :  { %v1094_v30 = vpop.eup %1093 }
 0x67c   :  { %v663_v58 = vsel %vm305_vm8, %v1094_v30, 0.0 }
 0x67d   :  { %664 = vadd.xlane.f32.xlu2 %v663_v58 }
 0x67e   :  { %v549_v7 = vpop.xlane.xlu0 %548 }
 0x67f   :  { %v550_v59 = vsub.f32 %v546_v53, %v549_v7  ;;  %v1052_v53 = vld [vmem:[#allocation11] sm:$0xff] }
 0x680   :  { %829 = vmatpush.bf16.msrb.mxu3 %v1052_v53 }
 0x681   :  { %v551_v61 = vmul.f32 1.442695, %v550_v59 }
 0x683   :  { %1095 = vpow2.f32 %v551_v61 }
 0x688   :  { %v670_v62 = vpop.permute.xlu1 %669 }
 0x689   :  { %v1096_v15 = vpop.eup %1095  ;;  %v675_v63 = vsel %vm323_vm9, %v670_v62, 0 }
 0x68a   :  { %684 = vmatpush.bf16.msrb.mxu1 %v675_v63  ;;  %v553_v0 = vsel %vm305_vm8, %v1096_v15, 0.0 }
 0x68b   :  { %554 = vadd.xlane.f32.xlu0 %v553_v0 }
 0x695   :  { %559 = vrot.lane.b32.xlu2 %v1509_v40, %s1266_s26  ;;  %s1283_s26 = smov 8  }
 0x69f   :  { %469 = vrot.lane.b32.xlu0 %v1535_v11, %s1270_s22 }
 0x6f0   :  { %v665_v24 = vpop.xlane.xlu2 %664 }
 0x6f1   :  { %1097 = vrcp.f32 %v665_v24 }
 0x6f7   :  { %v1098_v32 = vpop.eup %1097 }
 0x6f8   :  { %v667_v21 = vmul.f32 %v1098_v32, %v1094_v30  ;;  %v560_v1 = vpop.permute.xlu2 %559 }
 0x6f9   :  { %v565_v2 = vsel %vm323_vm9, %v560_v1, 0  ;;  %v1079_v1 = vld [vmem:[%s1655_s8] ss:$0 sm:$0xff] }
 0x6fa   :  { %v668_v3 = vpack.c.bf16 %v667_v21, %v667_v21  ;;  %574 = vmatpush.bf16.msra.mxu2 %v565_v2 }
 0x6fc   :  { %1009 = vmatmul.msk.bf16.vlgmr.msrb.gmra.mxu1 %vm305_vm8, %v668_v3 }
 0x6fe   :  { %v555_v5 = vpop.xlane.xlu0 %554  ;;  %723 = vmatpush.bf16.msrb.mxu2 %v1051_v8  ;;  %v1056_v8 = vld [vmem:[%s1659_s12 + $0x10] sm:$0xff] }
 0x6ff   :  { %1099 = vrcp.f32 %v555_v5 }
 0x700   :  { %1101 = vrcp.f32 %v1280_v35 }
 0x702   :  { %724 = vmatpush.bf16.msrb.mxu2 %v1050_v14  ;;  %v1055_v14 = vld [vmem:[%s1659_s12 + $0x8] sm:$0xff] }
 0x705   :  { %v1100_v6 = vpop.eup %1099 }
 0x706   :  { %v557_v10 = vmul.f32 %v1100_v6, %v1096_v15  ;;  %v1102_v36 = vpop.eup %1101  ;;  %v1080_v6 = vld [vmem:[%s1656_s9] ss:$0 sm:$0xff] }
 0x707   :  { %v742_v37 = vmul.f32 32.0, %v1102_v36  ;;  %vm746_vm11 = vweird.f32 %v1102_v36 }
 0x708   :  { %v558_v17 = vpack.c.bf16 %v557_v10, %v557_v10 }
 0x709   :  { %v743_v38 = vsub.f32 1.0, %v742_v37 }
 0x70a   :  { %1006 = vmatmul.msk.bf16.vlgmr.msra.gmra.mxu2 %vm305_vm8, %v558_v17 }
 0x70b   :  { %v744_v50 = vmul.f32 %v1102_v36, %v743_v38 }
 0x70d   :  { %v745_v39 = vadd.f32 %v1102_v36, %v744_v50 }
 0x70f   :  { %v1595_v9 = vsel %vm746_vm11, %v1102_v36, %v745_v39 }
 0x711   :  { %v470_v40 = vpop.permute.xlu0 %469 }
 0x712   :  { %473 = vst.msk [vmem:[#allocation2] sm:$0xff] %vm472_vm10, %v470_v40 }
 0x719   :  { %v695_v18 = vld [vmem:[#allocation2] sm:$0xff] }
 0x779   :  { %v686_v11 = vpop.f32.mrf.mxu1 }
 0x77a   :  { %691 = vrot.lane.b32.xlu1 %v686_v11, %s1270_s22 }
 0x781   :  { %v688_v12 = vpop.f32.mrf.mxu1 }
 0x78d   :  { %v576_v13 = vpop.f32.mrf.mxu2 }
 0x78e   :  { %580 = vst.msk [vmem:[#allocation2 + $0x8] sm:$0xff] %vm223_vm1, %v576_v13 }
 0x795   :  { %v578_v4 = vpop.f32.mrf.mxu2 }
 0x796   :  { %v1057_v4 = vld [vmem:[%s1659_s12 + $0x18] sm:$0xff] }
 0x797   :  { %883 = vmatpush.bf16.msra.mxu0 %v1057_v4 }
 0x79b   :  { %884 = vmatpush.bf16.msra.mxu0 %v1056_v8 }
 0x79f   :  { %885 = vmatpush.bf16.msra.mxu0 %v1055_v14 }
 0x7ec   :  { %v692_v16 = vpop.permute.xlu1 %691 }
 0x7ed   :  { %694 = vst.msk [vmem:[#allocation2 + $0x8] sm:$0xff] %vm472_vm10, %v692_v16  ;;  %v1054_v16 = vld [vmem:[%s1659_s12] sm:$0xff] }
 0x7ee   :  { %886 = vmatpush.bf16.msra.mxu0 %v1054_v16 }
 0x7f4   :  { %v696_v19 = vld [vmem:[#allocation2 + $0x8] sm:$0xff] }
 0x7f5   :  { %v697_v20 = vpack.c.bf16 %v696_v19, %v695_v18  ;;  %v1081_v19 = vld [vmem:[%s1658_s11] ss:$0 sm:$0xff] }
 0x7f7   :  { %1018 = vmatmul.msk.bf16.vlgmr.msrb.gmra.mxu2 %vm150_vm0, %v697_v20 }
 0x87a   :  { %v726_v25 = vpop.f32.mrf.mxu2 }
 0x87b   :  { %v733_v26 = vadd.f32 %v731_v23, %v726_v25 }
 0x87d   :  { %v735_v27 = vsel %vm150_vm0, %v733_v26, 0.0 }
 0x87e   :  { %736 = vadd.xlane.f32.xlu2 %v735_v27 }
 0x882   :  { %v728_v29 = vpop.f32.mrf.mxu2 }
 0x883   :  { %v734_v33 = vadd.f32 %v732_v28, %v728_v29  ;;  %v1082_v28 = vld [vmem:[%s1660_s13] ss:$0 sm:$0xff] }
 0x885   :  { %v738_v34 = vsel %vm150_vm0, %v734_v33, 0.0 }
 0x886   :  { %739 = vadd.xlane.f32.xlu0 %v738_v34 }
 0x8f1   :  { %v737_v41 = vpop.xlane.xlu2 %736 }
 0x8f2   :  { %v748_v31 = vmul.f32 %v1595_v9, %v737_v41 }
 0x8f4   :  { %v750_v42 = vsub.f32 %v733_v26, %v748_v31 }
 0x8f6   :  { %v752_v43 = vmul.f32 %v750_v42, %v750_v42 }
 0x8f8   :  { %v754_v44 = vsel %vm150_vm0, %v752_v43, 0.0 }
 0x8f9   :  { %v740_v45 = vpop.xlane.xlu0 %739  ;;  %755 = vadd.xlane.f32.xlu1 %v754_v44 }
 0x8fa   :  { %v749_v46 = vmul.f32 %v1595_v9, %v740_v45 }
 0x8fc   :  { %v751_v60 = vsub.f32 %v734_v33, %v749_v46 }
 0x8fe   :  { %v753_v47 = vmul.f32 %v751_v60, %v751_v60 }
 0x900   :  { %v757_v48 = vsel %vm150_vm0, %v753_v47, 0.0 }
 0x901   :  { %758 = vadd.xlane.f32.xlu2 %v757_v48 }
 0x96c   :  { %v756_v51 = vpop.xlane.xlu1 %755 }
 0x96d   :  { %v760_v52 = vmul.f32 %v756_v51, %v1595_v9 }
 0x96f   :  { %v762_v54 = vadd.f32 1e-05, %v760_v52 }
 0x971   :  { %1103 = vrsqrt.f32 %v762_v54  ;;  %vm770_vm13 = vweird.f32 %v762_v54 }
 0x974   :  { %v759_v55 = vpop.xlane.xlu2 %758 }
 0x975   :  { %v761_v56 = vmul.f32 %v759_v55, %v1595_v9 }
 0x977   :  { %v1104_v57 = vpop.eup %1103  ;;  %v763_v30 = vadd.f32 1e-05, %v761_v56 }
 0x978   :  { %v765_v58 = vmul.f32 %v1104_v57, %v762_v54  ;;  %vm771_vm12 = vweird.f32 %v1104_v57 }
 0x979   :  { %1105 = vrsqrt.f32 %v763_v30  ;;  %vm772_vm14 = vmor %vm770_vm13, %vm771_vm12  ;;  %vm780_vm1 = vweird.f32 %v763_v30 }
 0x97a   :  { %v766_v7 = vmul.f32 %v1104_v57, %v765_v58 }
 0x97c   :  { %v767_v59 = vmul.f32 0.5, %v766_v7 }
 0x97e   :  { %v768_v61 = vsub.f32 1.5, %v767_v59 }
 0x97f   :  { %v1106_v62 = vpop.eup %1105 }
 0x980   :  { %v769_v15 = vmul.f32 %v1104_v57, %v768_v61  ;;  %v775_v63 = vmul.f32 %v1106_v62, %v763_v30  ;;  %vm781_vm15 = vweird.f32 %v1106_v62 }
 0x981   :  { %vm782_vm2 = vmor %vm780_vm1, %vm781_vm15 }
 0x982   :  { %v776_v0 = vmul.f32 %v1106_v62, %v775_v63  ;;  %v773_v24 = vsel %vm772_vm14, %v1104_v57, %v769_v15 }
 0x983   :  { %v784_v2 = vmul.f32 %v773_v24, %v750_v42 }
 0x984   :  { %v777_v32 = vmul.f32 0.5, %v776_v0 }
 0x985   :  { %v790_v10 = vmul.f32 %v1079_v1, %v784_v2 }
 0x986   :  { %v778_v21 = vsub.f32 1.5, %v777_v32 }
 0x987   :  { %v796_v11 = vadd.f32 %v1080_v6, %v790_v10 }
 0x988   :  { %v779_v3 = vmul.f32 %v1106_v62, %v778_v21 }
 0x98a   :  { %v783_v5 = vsel %vm782_vm2, %v1106_v62, %v779_v3  ;;  %v1083_v62 = vld [vmem:[%s1661_s14] ss:$0 sm:$0xff]  ;;  %s1281_s14 = smov [#allocation12]  }
 0x98b   :  { %v785_v17 = vmul.f32 %v783_v5, %v751_v60  ;;  %s957_s29 = sshll.u32 %s1281_s14, 4  ;;  %s958_s29 = int_to_ptr.vmem [resolvable:$true] %s957_s29 }
 0x98d   :  { %v791_v40 = vmul.f32 %v1079_v1, %v785_v17 }
 0x98f   :  { %v797_v12 = vadd.f32 %v1080_v6, %v791_v40 }
 0x991   :  { %v798_v13 = vpack.c.bf16 %v797_v12, %v796_v11 }
 0x993   :  { %1027 = vmatmul.msk.bf16.vlgmr.msrb.gmra.mxu3 %vm150_vm0, %v798_v13 }
 0xa16   :  { %v831_v18 = vpop.f32.mrf.mxu3 }
 0xa17   :  { %v832_v20 = vadd.f32 %v1081_v19, %v831_v18 }
 0xa19   :  { %v836_v25 = vmax.f32 %v832_v20, 0.0 }
 0xa1e   :  { %v833_v22 = vpop.f32.mrf.mxu3 }
 0xa1f   :  { %v834_v23 = vadd.f32 %v1081_v19, %v833_v22 }
 0xa21   :  { %v837_v26 = vmax.f32 %v834_v23, 0.0 }
 0xa23   :  { %v838_v27 = vpack.c.bf16 %v837_v26, %v836_v25 }
 0xa25   :  { %1044 = vmatmul.msk.bf16.vlgmr.msra.gmra.mxu0 %vm875_vm3, %v838_v27 }
 0xaa2   :  { %v888_v29 = vpop.f32.mrf.mxu0 }
 0xaa3   :  { %v889_v33 = vadd.f32 %v1082_v28, %v888_v29 }
 0xaa5   :  { %v893_v34 = vadd.f32 %v889_v33, %v796_v11 }
 0xaa7   :  { %v895_v35 = vsel %vm150_vm0, %v893_v34, 0.0 }
 0xaa8   :  { %896 = vadd.xlane.f32.xlu0 %v895_v35 }
 0xaaa   :  { %v890_v36 = vpop.f32.mrf.mxu0 }
 0xaab   :  { %v891_v37 = vadd.f32 %v1082_v28, %v890_v36 }
 0xaad   :  { %v894_v38 = vadd.f32 %v891_v37, %v797_v12 }
 0xaaf   :  { %v898_v50 = vsel %vm150_vm0, %v894_v38, 0.0 }
 0xab0   :  { %899 = vadd.xlane.f32.xlu1 %v898_v50 }
 0xb1b   :  { %v897_v39 = vpop.xlane.xlu0 %896 }
 0xb1c   :  { %v901_v41 = vmul.f32 %v897_v39, %v1595_v9 }
 0xb1e   :  { %v903_v31 = vsub.f32 %v893_v34, %v901_v41 }
 0xb20   :  { %v905_v42 = vmul.f32 %v903_v31, %v903_v31 }
 0xb22   :  { %v907_v43 = vsel %vm150_vm0, %v905_v42, 0.0 }
 0xb23   :  { %v900_v44 = vpop.xlane.xlu1 %899  ;;  %908 = vadd.xlane.f32.xlu2 %v907_v43 }
 0xb24   :  { %v902_v45 = vmul.f32 %v900_v44, %v1595_v9 }
 0xb26   :  { %v904_v46 = vsub.f32 %v894_v38, %v902_v45 }
 0xb28   :  { %v906_v60 = vmul.f32 %v904_v46, %v904_v46 }
 0xb2a   :  { %v910_v47 = vsel %vm150_vm0, %v906_v60, 0.0 }
 0xb2b   :  { %911 = vadd.xlane.f32.xlu0 %v910_v47 }
 0xb96   :  { %v909_v48 = vpop.xlane.xlu2 %908 }
 0xb97   :  { %v913_v49 = vmul.f32 %v909_v48, %v1595_v9 }
 0xb99   :  { %v915_v51 = vadd.f32 1e-05, %v913_v49 }
 0xb9b   :  { %1107 = vrsqrt.f32 %v915_v51  ;;  %vm923_vm5 = vweird.f32 %v915_v51 }
 0xb9e   :  { %v912_v52 = vpop.xlane.xlu0 %911 }
 0xb9f   :  { %v914_v53 = vmul.f32 %v912_v52, %v1595_v9  ;;  %v1084_v9 = vld [vmem:[%s1662_s15] ss:$0 sm:$0xff]  ;;  %s1282_s15 = smov 128  }
 0xba1   :  { %v1108_v54 = vpop.eup %1107  ;;  %v916_v55 = vadd.f32 1e-05, %v914_v53 }
 0xba2   :  { %v918_v56 = vmul.f32 %v1108_v54, %v915_v51  ;;  %vm924_vm4 = vweird.f32 %v1108_v54 }
 0xba3   :  { %1109 = vrsqrt.f32 %v916_v55  ;;  %vm925_vm6 = vmor %vm923_vm5, %vm924_vm4  ;;  %vm933_vm8 = vweird.f32 %v916_v55 }
 0xba4   :  { %v919_v57 = vmul.f32 %v1108_v54, %v918_v56 }
 0xba6   :  { %v920_v30 = vmul.f32 0.5, %v919_v57 }
 0xba8   :  { %v921_v58 = vsub.f32 1.5, %v920_v30 }
 0xba9   :  { %v1110_v7 = vpop.eup %1109 }
 0xbaa   :  { %v922_v59 = vmul.f32 %v1108_v54, %v921_v58  ;;  %v928_v61 = vmul.f32 %v1110_v7, %v916_v55  ;;  %vm934_vm7 = vweird.f32 %v1110_v7 }
 0xbab   :  { %vm935_vm9 = vmor %vm933_vm8, %vm934_vm7 }
 0xbac   :  { %v926_v15 = vsel %vm925_vm6, %v1108_v54, %v922_v59  ;;  %v929_v63 = vmul.f32 %v1110_v7, %v928_v61 }
 0xbad   :  { %v937_v0 = vmul.f32 %v926_v15, %v903_v31 }
 0xbae   :  { %v930_v24 = vmul.f32 0.5, %v929_v63 }
 0xbaf   :  { %v943_v32 = vmul.f32 %v1083_v62, %v937_v0 }
 0xbb0   :  { %v931_v21 = vsub.f32 1.5, %v930_v24 }
 0xbb1   :  { %v949_v1 = vadd.f32 %v1084_v9, %v943_v32 }
 0xbb2   :  { %v932_v2 = vmul.f32 %v1110_v7, %v931_v21 }
 0xbb3   :  { %951 = vst.msk [vmem:[#allocation12] sm:$0xff] %vm150_vm0, %v949_v1 }
 0xbb4   :  { %v936_v3 = vsel %vm935_vm9, %v1110_v7, %v932_v2 }
 0xbb5   :  { %v938_v5 = vmul.f32 %v936_v3, %v904_v46 }
 0xbb7   :  { %v944_v6 = vmul.f32 %v1083_v62, %v938_v5 }
 0xbb9   :  { %v950_v10 = vadd.f32 %v1084_v9, %v944_v6 }
 0xbbb   :  { %952 = vst.msk [vmem:[#allocation12 + $0x8] sm:$0xff] %vm150_vm0, %v950_v10 }
 0xbbc   :  { %965 = dma.vmem_to_hbm [thread:$0]  %s958_s29, 256, %s960_s0, [#allocation5], %s1282_s15, %s1282_s15, %s1283_s26  }
 0xbbd   :  { %1261 = dma.done.wait [#allocation5], 256  }
 0xbbe   :  { %1262 = vsyncadd [#allocation5], 4294967040 }
 0xbbf   :  { %970 = vsyncpa [#allocation4], 1 }
 0xbc0   :  { %971 = vsyncpa [#allocation7], 1 }
 0xbc1   :  { %972 = vsyncpa [#allocation10], 1 }
 0xbc2   :  { %973 = vsyncpa [#allocation5], 1 }

</bundles_post_ra>
